<compile_context>
chip_gen: v7x
topology: tpu7x:2x2x1
jax: 0.10.0
libtpu: 0.0.40
codegen_flags: <defaults>
</compile_context>

<pallas_src>
import functools

import numpy as np
import jax
import jax.numpy as jnp
from jax.experimental import pallas as pl
from jax.experimental.pallas import tpu as pltpu


# ----------------------------------------------------------------------------
# Pallas kernel
# ----------------------------------------------------------------------------
def actor_kernel(c_ref,                      # SMEM (1,): -(sum(log_std)+0.5*log(2pi)*A)
                 state_ref, action_ref, noise_ref,
                 w1_ref, b1_ref, w2_ref, b2_ref, wm_ref, bm_ref,
                 std_ref, invstd_ref,
                 out_ref, *, act_dim):
    f32 = jnp.float32

    x = state_ref[...]                                            # (TB, S)

    # a = tanh(l1(state)); a = tanh(l2(a)); mu = mean(a)
    a = jnp.tanh(jnp.dot(x, w1_ref[...],
                         preferred_element_type=f32) + b1_ref[...])   # (TB, HP)
    a = jnp.tanh(jnp.dot(a, w2_ref[...],
                         preferred_element_type=f32) + b2_ref[...])   # (TB, HP)
    mu = jnp.dot(a, wm_ref[...],
                 preferred_element_type=f32) + bm_ref[...]            # (TB, A)

    noise = noise_ref[...]                                        # (TB, A)
    action = action_ref[...]                                      # (TB, A)
    neg_c = c_ref[0]                                              # scalar

    # pi = mu + noise * std   (exact f32 elementwise)
    pi = mu + noise * std_ref[...]

    # gaussian_logprob(noise, log_std).sum(-1)
    #   = -0.5*sum(noise^2) - sum(log_std) - 0.5*log(2pi)*A
    # (log_std terms hoisted into neg_c)
    logp_pi = -0.5 * jnp.sum(noise * noise, axis=-1, keepdims=True) + neg_c

    noise_action = (action - mu) * invstd_ref[...]                # (TB, A)
    logp_a = -0.5 * jnp.sum(noise_action * noise_action,
                            axis=-1, keepdims=True) + neg_c

    # Pack [pi | logp_pi | logp_a | 0...] into the (TB, 128) output block.
    # Both stores below hit the VMEM output buffer; the HBM writeback is the
    # single lane-dense full-block DMA either way.
    lane = jax.lax.broadcasted_iota(jnp.int32, out_ref.shape, 1)
    tail = jnp.where(lane == act_dim, logp_pi, jnp.float32(0.0))
    tail = jnp.where(lane == act_dim + 1, logp_a, tail)
    out_ref[...] = tail.astype(out_ref.dtype)                     # full-width store
    out_ref[:, :act_dim] = pi.astype(out_ref.dtype)               # narrow VMEM store


# ----------------------------------------------------------------------------
# One-time parameter preparation (hoisted out of the hot path; cache the result)
# ----------------------------------------------------------------------------
def _round_up(x, m):
    return ((x + m - 1) // m) * m


def _pad2d(x, rows, cols):
    r, c = x.shape
    return jnp.pad(x, ((0, rows - r), (0, cols - c)))


def prepare_params(params):
    """Pad/derive everything that does not depend on the batch. Call once."""
    S, H = params["w1"].shape
    A = params["wm"].shape[1]
    HP = _round_up(H, 128)
    f32 = jnp.float32

    w1 = _pad2d(params["w1"].astype(f32), S, HP)      # (S, HP)   pad out-dim only
    b1 = _pad2d(params["b1"].astype(f32), 1, HP)      # (1, HP)
    w2 = _pad2d(params["w2"].astype(f32), HP, HP)     # (HP, HP)
    b2 = _pad2d(params["b2"].astype(f32), 1, HP)      # (1, HP)
    wm = _pad2d(params["wm"].astype(f32), HP, A)      # (HP, A)   pad K-dim only
    bm = params["bm"].astype(f32)                     # (1, A)

    log_std = params["log_std"].astype(f32)           # (1, A)
    std = jnp.exp(log_std)                            # (1, A)
    inv_std = 1.0 / (std + f32(1e-8))                 # (1, A)
    neg_c = -(jnp.sum(log_std) + f32(0.5 * np.log(2.0 * np.pi) * A))
    neg_c = jnp.reshape(neg_c, (1,)).astype(f32)      # (1,) SMEM scalar

    return dict(w1=w1, b1=b1, w2=w2, b2=b2, wm=wm, bm=bm,
                std=std, inv_std=inv_std, neg_c=neg_c)


# ----------------------------------------------------------------------------
# Forward wrapper (hot path)
# ----------------------------------------------------------------------------
@functools.partial(jax.jit, static_argnames=("block_b",))
def continuous_actor_forward(state, action, noise, prep, *, block_b=1024):
    """Returns (pi, logp_pi, logp_a) matching ContinuousActor.forward semantics."""
    B, S = state.shape
    A = action.shape[1]
    HP = prep["w2"].shape[0]
    WA = _round_up(A + 2, 128)          # packed-output lane width
    f32 = jnp.float32

    # Batch tiling: target an even 2-step grid so v7x can shard the batch axis
    # over both TensorCores ("parallel"); on v5e/v6e the extra step costs only
    # ~0.35us. block_b caps the tile for very large batches.
    TB = min(block_b, _round_up(pl.cdiv(B, 2), 8))
    nb = pl.cdiv(B, TB)
    B_pad = nb * TB

    state = state.astype(f32)
    action = action.astype(f32)
    noise = noise.astype(f32)
    if B_pad != B:   # rare; demo shapes divide evenly so this stays off the hot path
        pad = ((0, B_pad - B), (0, 0))
        state = jnp.pad(state, pad)
        action = jnp.pad(action, pad)
        noise = jnp.pad(noise, pad)

    kernel = functools.partial(actor_kernel, act_dim=A)

    def resident(arr):
        # Same block every grid step -> weights stay resident in VMEM.
        return pl.BlockSpec(arr.shape, lambda i: (0, 0))

    out = pl.pallas_call(
        kernel,
        out_shape=jax.ShapeDtypeStruct((B_pad, WA), f32),
        grid=(nb,),
        in_specs=[
            pl.BlockSpec(memory_space=pltpu.MemorySpace.SMEM),   # neg_c scalar
            pl.BlockSpec((TB, S), lambda i: (i, 0)),             # state  (unpadded)
            pl.BlockSpec((TB, A), lambda i: (i, 0)),             # action (unpadded)
            pl.BlockSpec((TB, A), lambda i: (i, 0)),             # noise  (unpadded)
            resident(prep["w1"]), resident(prep["b1"]),          # l1
            resident(prep["w2"]), resident(prep["b2"]),          # l2
            resident(prep["wm"]), resident(prep["bm"]),          # mean head
            resident(prep["std"]), resident(prep["inv_std"]),    # std, 1/(std+eps)
        ],
        out_specs=pl.BlockSpec((TB, WA), lambda i: (i, 0)),
        compiler_params=pltpu.CompilerParams(
            dimension_semantics=("parallel",)),
    )(prep["neg_c"], state, action, noise,
      prep["w1"], prep["b1"], prep["w2"], prep["b2"],
      prep["wm"], prep["bm"], prep["std"], prep["inv_std"])

    out = out[:B]
    pi = out[:, :A]
    logp_pi = out[:, A]       # torch: .sum(axis=-1) of (B,1) -> (B,)
    logp_a = out[:, A + 1]
    return pi, logp_pi, logp_a


# ----------------------------------------------------------------------------
# Deterministic parameter init (mirrors weight_init: orthogonal W, zero bias)
# ----------------------------------------------------------------------------
def orthogonal(key, out_dim, in_dim):
    a = jax.random.normal(key, (out_dim, in_dim), dtype=jnp.float32)
    if out_dim < in_dim:
        q, r = jnp.linalg.qr(a.T)
        q = q * jnp.sign(jnp.diag(r))
        w = q.T[:out_dim, :in_dim]
    else:
        q, r = jnp.linalg.qr(a)
        q = q * jnp.sign(jnp.diag(r))
        w = q[:out_dim, :in_dim]
    return w  # (out, in)


def make_params(key, state_dim, action_dim, hidden_dim=64):
    k1, k2, k3 = jax.random.split(key, 3)
    w1 = orthogonal(k1, hidden_dim, state_dim).T      # (S, H)
    w2 = orthogonal(k2, hidden_dim, hidden_dim).T     # (H, H)
    wm = orthogonal(k3, action_dim, hidden_dim).T     # (H, A)
    return {
        "w1": w1, "b1": jnp.zeros((1, hidden_dim), jnp.float32),
        "w2": w2, "b2": jnp.zeros((1, hidden_dim), jnp.float32),
        "wm": wm, "bm": jnp.zeros((1, action_dim), jnp.float32),
        "log_std": jnp.full((1, action_dim), -0.5, jnp.float32),
    }


# ----------------------------------------------------------------------------
# Pure-JAX reference for sanity check
# ----------------------------------------------------------------------------
def reference_forward(state, action, noise, p):
    a = jnp.tanh(state @ p["w1"] + p["b1"])
    a = jnp.tanh(a @ p["w2"] + p["b2"])
    mu = a @ p["wm"] + p["bm"]
    log_std = p["log_std"]
    std = jnp.exp(log_std)
    A = mu.shape[-1]
    const = 0.5 * np.log(2 * np.pi) * A

    def glp(n):
        return jnp.sum(-0.5 * n * n - log_std, axis=-1) - const

    na = (action - mu) / (std + 1e-8)
    pi = mu + noise * std
    return pi, glp(noise), glp(na)


if __name__ == "__main__":
    batch, state_dim, action_dim, hidden_dim = 512, 16, 4, 64

    key = jax.random.PRNGKey(0)
    kp, ks, ka, kn = jax.random.split(key, 4)

    params = make_params(kp, state_dim, action_dim, hidden_dim)
    prep = prepare_params(params)          # one-time prep, cached outside hot path

    state = jax.random.normal(ks, (batch, state_dim), dtype=jnp.float32)
    action = jax.random.normal(ka, (batch, action_dim), dtype=jnp.float32)
    # deterministic stand-in for torch.randn_like(mu)
    # TODO(synk): could generate this in-kernel with pltpu.prng_* to drop one
    #             input stream, but that changes the random stream.
    noise = jax.random.normal(kn, (batch, action_dim), dtype=jnp.float32)

    pi, logp_pi, logp_a = continuous_actor_forward(state, action, noise, prep)
    jax.block_until_ready((pi, logp_pi, logp_a))

    pi_r, logp_pi_r, logp_a_r = reference_forward(state, action, noise, params)
    assert pi.shape == (batch, action_dim)
    assert logp_pi.shape == (batch,)
    assert logp_a.shape == (batch,)
    np.testing.assert_allclose(np.asarray(pi), np.asarray(pi_r),
                               rtol=1e-4, atol=1e-4)
    np.testing.assert_allclose(np.asarray(logp_pi), np.asarray(logp_pi_r),
                               rtol=1e-4, atol=1e-4)
    np.testing.assert_allclose(np.asarray(logp_a), np.asarray(logp_a_r),
                               rtol=1e-4, atol=1e-4)

    print("KERNEL_OK")
</pallas_src>

<mosaic_0001>
module attributes {stable_mosaic.version = 11 : i64} {
  func.func @actor_kernel(%arg0: i32, %arg1: memref<1xf32, #tpu.memory_space<smem>>, %arg2: memref<256x16xf32, #tpu.memory_space<vmem>>, %arg3: memref<256x4xf32, #tpu.memory_space<vmem>>, %arg4: memref<256x4xf32, #tpu.memory_space<vmem>>, %arg5: memref<16x128xf32, #tpu.memory_space<vmem>>, %arg6: memref<1x128xf32, #tpu.memory_space<vmem>>, %arg7: memref<128x128xf32, #tpu.memory_space<vmem>>, %arg8: memref<1x128xf32, #tpu.memory_space<vmem>>, %arg9: memref<128x4xf32, #tpu.memory_space<vmem>>, %arg10: memref<1x4xf32, #tpu.memory_space<vmem>>, %arg11: memref<1x4xf32, #tpu.memory_space<vmem>>, %arg12: memref<1x4xf32, #tpu.memory_space<vmem>>, %arg13: memref<256x128xf32, #tpu.memory_space<vmem>>) attributes {dimension_semantics = [#tpu.dimension_semantics<parallel>], iteration_bounds = array<i64: 2>, scalar_prefetch = 0 : i64, scratch_operands = 0 : i64, tpu.core_type = #tpu.core_type<tc>, window_params = [{transform_indices = @transform_0, window_bounds = array<i64: 1>}, {transform_indices = @transform_1, window_bounds = array<i64: 256, 16>}, {transform_indices = @transform_2, window_bounds = array<i64: 256, 4>}, {transform_indices = @transform_3, window_bounds = array<i64: 256, 4>}, {pipeline_mode = #tpu.pipeline_mode<synchronous>, transform_indices = @transform_4, window_bounds = array<i64: 16, 128>}, {pipeline_mode = #tpu.pipeline_mode<synchronous>, transform_indices = @transform_5, window_bounds = array<i64: 1, 128>}, {pipeline_mode = #tpu.pipeline_mode<synchronous>, transform_indices = @transform_6, window_bounds = array<i64: 128, 128>}, {pipeline_mode = #tpu.pipeline_mode<synchronous>, transform_indices = @transform_7, window_bounds = array<i64: 1, 128>}, {pipeline_mode = #tpu.pipeline_mode<synchronous>, transform_indices = @transform_8, window_bounds = array<i64: 128, 4>}, {pipeline_mode = #tpu.pipeline_mode<synchronous>, transform_indices = @transform_9, window_bounds = array<i64: 1, 4>}, {pipeline_mode = #tpu.pipeline_mode<synchronous>, transform_indices = @transform_10, window_bounds = array<i64: 1, 4>}, {pipeline_mode = #tpu.pipeline_mode<synchronous>, transform_indices = @transform_11, window_bounds = array<i64: 1, 4>}, {transform_indices = @transform_12, window_bounds = array<i64: 256, 128>}]} {
    %c0 = arith.constant 0 : index
    %c0_0 = arith.constant 0 : index
    %0 = vector.load %arg2[%c0, %c0_0] : memref<256x16xf32, #tpu.memory_space<vmem>>, vector<256x16xf32>
    %c0_1 = arith.constant 0 : index
    %c0_2 = arith.constant 0 : index
    %1 = vector.load %arg5[%c0_1, %c0_2] : memref<16x128xf32, #tpu.memory_space<vmem>>, vector<16x128xf32>
    %cst = arith.constant dense<0.000000e+00> : vector<256x128xf32>
    %2 = tpu.matmul %0, %1, %cst {dimension_numbers = #tpu.dot_dimension_numbers<[1], [0], [0], [1], [0, 0, 1, 1], [], []>} : vector<256x16xf32>, vector<16x128xf32>, vector<256x128xf32> -> vector<256x128xf32>
    %c0_3 = arith.constant 0 : index
    %c0_4 = arith.constant 0 : index
    %3 = vector.load %arg6[%c0_3, %c0_4] : memref<1x128xf32, #tpu.memory_space<vmem>>, vector<1x128xf32>
    %4 = vector.broadcast %3 : vector<1x128xf32> to vector<256x128xf32>
    %5 = arith.addf %2, %4 : vector<256x128xf32>
    %6 = math.tanh %5 : vector<256x128xf32>
    %c0_5 = arith.constant 0 : index
    %c0_6 = arith.constant 0 : index
    %7 = vector.load %arg7[%c0_5, %c0_6] : memref<128x128xf32, #tpu.memory_space<vmem>>, vector<128x128xf32>
    %cst_7 = arith.constant dense<0.000000e+00> : vector<256x128xf32>
    %8 = tpu.matmul %6, %7, %cst_7 {dimension_numbers = #tpu.dot_dimension_numbers<[1], [0], [0], [1], [0, 0, 1, 1], [], []>} : vector<256x128xf32>, vector<128x128xf32>, vector<256x128xf32> -> vector<256x128xf32>
    %c0_8 = arith.constant 0 : index
    %c0_9 = arith.constant 0 : index
    %9 = vector.load %arg8[%c0_8, %c0_9] : memref<1x128xf32, #tpu.memory_space<vmem>>, vector<1x128xf32>
    %10 = vector.broadcast %9 : vector<1x128xf32> to vector<256x128xf32>
    %11 = arith.addf %8, %10 : vector<256x128xf32>
    %12 = math.tanh %11 : vector<256x128xf32>
    %c0_10 = arith.constant 0 : index
    %c0_11 = arith.constant 0 : index
    %13 = vector.load %arg9[%c0_10, %c0_11] : memref<128x4xf32, #tpu.memory_space<vmem>>, vector<128x4xf32>
    %cst_12 = arith.constant dense<0.000000e+00> : vector<256x4xf32>
    %14 = tpu.matmul %12, %13, %cst_12 {dimension_numbers = #tpu.dot_dimension_numbers<[1], [0], [0], [1], [0, 0, 1, 1], [], []>} : vector<256x128xf32>, vector<128x4xf32>, vector<256x4xf32> -> vector<256x4xf32>
    %c0_13 = arith.constant 0 : index
    %c0_14 = arith.constant 0 : index
    %15 = vector.load %arg10[%c0_13, %c0_14] : memref<1x4xf32, #tpu.memory_space<vmem>>, vector<1x4xf32>
    %16 = vector.broadcast %15 : vector<1x4xf32> to vector<256x4xf32>
    %17 = arith.addf %14, %16 : vector<256x4xf32>
    %c0_15 = arith.constant 0 : index
    %c0_16 = arith.constant 0 : index
    %18 = vector.load %arg4[%c0_15, %c0_16] : memref<256x4xf32, #tpu.memory_space<vmem>>, vector<256x4xf32>
    %c0_17 = arith.constant 0 : index
    %c0_18 = arith.constant 0 : index
    %19 = vector.load %arg3[%c0_17, %c0_18] : memref<256x4xf32, #tpu.memory_space<vmem>>, vector<256x4xf32>
    %c0_19 = arith.constant 0 : index
    %20 = memref.load %arg1[%c0_19] : memref<1xf32, #tpu.memory_space<smem>>
    %c0_20 = arith.constant 0 : index
    %c0_21 = arith.constant 0 : index
    %21 = vector.load %arg11[%c0_20, %c0_21] : memref<1x4xf32, #tpu.memory_space<vmem>>, vector<1x4xf32>
    %22 = vector.broadcast %21 : vector<1x4xf32> to vector<256x4xf32>
    %23 = arith.mulf %18, %22 : vector<256x4xf32>
    %24 = arith.addf %17, %23 : vector<256x4xf32>
    %25 = arith.mulf %18, %18 : vector<256x4xf32>
    %cst_22 = arith.constant dense<0.000000e+00> : vector<256xf32>
    %26 = vector.multi_reduction <add>, %25, %cst_22 [1] : vector<256x4xf32> to vector<256xf32>
    %27 = vector.shape_cast %26 : vector<256xf32> to vector<256x1xf32>
    %cst_23 = arith.constant -5.000000e-01 : f32
    %28 = vector.broadcast %cst_23 : f32 to vector<256x1xf32>
    %29 = arith.mulf %28, %27 : vector<256x1xf32>
    %30 = vector.broadcast %20 : f32 to vector<256x1xf32>
    %31 = arith.addf %29, %30 : vector<256x1xf32>
    %32 = arith.subf %19, %17 : vector<256x4xf32>
    %c0_24 = arith.constant 0 : index
    %c0_25 = arith.constant 0 : index
    %33 = vector.load %arg12[%c0_24, %c0_25] : memref<1x4xf32, #tpu.memory_space<vmem>>, vector<1x4xf32>
    %34 = vector.broadcast %33 : vector<1x4xf32> to vector<256x4xf32>
    %35 = arith.mulf %32, %34 : vector<256x4xf32>
    %36 = arith.mulf %35, %35 : vector<256x4xf32>
    %cst_26 = arith.constant dense<0.000000e+00> : vector<256xf32>
    %37 = vector.multi_reduction <add>, %36, %cst_26 [1] : vector<256x4xf32> to vector<256xf32>
    %38 = vector.shape_cast %37 : vector<256xf32> to vector<256x1xf32>
    %cst_27 = arith.constant -5.000000e-01 : f32
    %39 = vector.broadcast %cst_27 : f32 to vector<256x1xf32>
    %40 = arith.mulf %39, %38 : vector<256x1xf32>
    %41 = vector.broadcast %20 : f32 to vector<256x1xf32>
    %42 = arith.addf %40, %41 : vector<256x1xf32>
    %43 = tpu.iota {dimensions = array<i32: 1>} : vector<256x128xi32>
    %c4_i32 = arith.constant 4 : i32
    %44 = vector.broadcast %c4_i32 : i32 to vector<256x128xi32>
    %45 = arith.cmpi eq, %43, %44 : vector<256x128xi32>
    %cst_28 = arith.constant 0.000000e+00 : f32
    %46 = vector.shape_cast %31 : vector<256x1xf32> to vector<256x1xf32>
    %47 = vector.broadcast %46 : vector<256x1xf32> to vector<256x128xf32>
    %48 = vector.broadcast %cst_28 : f32 to vector<256x128xf32>
    %49 = arith.select %45, %47, %48 : vector<256x128xi1>, vector<256x128xf32>
    %c5_i32 = arith.constant 5 : i32
    %50 = vector.broadcast %c5_i32 : i32 to vector<256x128xi32>
    %51 = arith.cmpi eq, %43, %50 : vector<256x128xi32>
    %52 = vector.shape_cast %42 : vector<256x1xf32> to vector<256x1xf32>
    %53 = vector.broadcast %52 : vector<256x1xf32> to vector<256x128xf32>
    %54 = arith.select %51, %53, %49 : vector<256x128xi1>, vector<256x128xf32>
    %c0_29 = arith.constant 0 : index
    %c0_30 = arith.constant 0 : index
    %55 = vector.load %arg13[%c0_29, %c0_30] : memref<256x128xf32, #tpu.memory_space<vmem>>, vector<256x128xf32>
    tpu.vector_store %arg13[%c0_29, %c0_30], %54 {strides = array<i32>} : memref<256x128xf32, #tpu.memory_space<vmem>>, vector<256x128xf32>,
    %c0_31 = arith.constant 0 : index
    %c0_32 = arith.constant 0 : index
    %56 = vector.load %arg13[%c0_31, %c0_32] : memref<256x128xf32, #tpu.memory_space<vmem>>, vector<256x4xf32>
    tpu.vector_store %arg13[%c0_31, %c0_32], %24 {strides = array<i32>} : memref<256x128xf32, #tpu.memory_space<vmem>>, vector<256x4xf32>,
    return
  }
  func.func @transform_0(%arg0: i32) -> i32 {
    %c0_i32 = arith.constant 0 : i32
    %c0_i32_0 = arith.constant 0 : i32
    return %c0_i32 : i32
  }
  func.func @transform_1(%arg0: i32) -> (i32, i32) {
    %c0_i32 = arith.constant 0 : i32
    %c0_i32_0 = arith.constant 0 : i32
    return %arg0, %c0_i32 : i32, i32
  }
  func.func @transform_2(%arg0: i32) -> (i32, i32) {
    %c0_i32 = arith.constant 0 : i32
    %c0_i32_0 = arith.constant 0 : i32
    return %arg0, %c0_i32 : i32, i32
  }
  func.func @transform_3(%arg0: i32) -> (i32, i32) {
    %c0_i32 = arith.constant 0 : i32
    %c0_i32_0 = arith.constant 0 : i32
    return %arg0, %c0_i32 : i32, i32
  }
  func.func @transform_4(%arg0: i32) -> (i32, i32) {
    %c0_i32 = arith.constant 0 : i32
    %c0_i32_0 = arith.constant 0 : i32
    %c0_i32_1 = arith.constant 0 : i32
    return %c0_i32, %c0_i32_0 : i32, i32
  }
  func.func @transform_5(%arg0: i32) -> (i32, i32) {
    %c0_i32 = arith.constant 0 : i32
    %c0_i32_0 = arith.constant 0 : i32
    %c0_i32_1 = arith.constant 0 : i32
    return %c0_i32, %c0_i32_0 : i32, i32
  }
  func.func @transform_6(%arg0: i32) -> (i32, i32) {
    %c0_i32 = arith.constant 0 : i32
    %c0_i32_0 = arith.constant 0 : i32
    %c0_i32_1 = arith.constant 0 : i32
    return %c0_i32, %c0_i32_0 : i32, i32
  }
  func.func @transform_7(%arg0: i32) -> (i32, i32) {
    %c0_i32 = arith.constant 0 : i32
    %c0_i32_0 = arith.constant 0 : i32
    %c0_i32_1 = arith.constant 0 : i32
    return %c0_i32, %c0_i32_0 : i32, i32
  }
  func.func @transform_8(%arg0: i32) -> (i32, i32) {
    %c0_i32 = arith.constant 0 : i32
    %c0_i32_0 = arith.constant 0 : i32
    %c0_i32_1 = arith.constant 0 : i32
    return %c0_i32, %c0_i32_0 : i32, i32
  }
  func.func @transform_9(%arg0: i32) -> (i32, i32) {
    %c0_i32 = arith.constant 0 : i32
    %c0_i32_0 = arith.constant 0 : i32
    %c0_i32_1 = arith.constant 0 : i32
    return %c0_i32, %c0_i32_0 : i32, i32
  }
  func.func @transform_10(%arg0: i32) -> (i32, i32) {
    %c0_i32 = arith.constant 0 : i32
    %c0_i32_0 = arith.constant 0 : i32
    %c0_i32_1 = arith.constant 0 : i32
    return %c0_i32, %c0_i32_0 : i32, i32
  }
  func.func @transform_11(%arg0: i32) -> (i32, i32) {
    %c0_i32 = arith.constant 0 : i32
    %c0_i32_0 = arith.constant 0 : i32
    %c0_i32_1 = arith.constant 0 : i32
    return %c0_i32, %c0_i32_0 : i32, i32
  }
  func.func @transform_12(%arg0: i32) -> (i32, i32) {
    %c0_i32 = arith.constant 0 : i32
    %c0_i32_0 = arith.constant 0 : i32
    return %arg0, %c0_i32 : i32, i32
  }
}

</mosaic_0001>

<bundles_post_ra>
// kernel: continuous_actor_forward.1
= control target key start
LH: loop header
LB: loop body
LE: loop exit
PB: predicated region body
PF: predicated region fallthrough
CT: control target
= control target key end

     0   :  { %s2893_s23 = smov 0   ;;  %s3994_s0 = inlined_call_operand.<no memory space> [shape: f32[1], index: 0, kind: input, shape index: {}]   ;;  %s3995_s1 = inlined_call_operand.vmem [shape: f32[512,16], index: 1, kind: input, shape index: {}]   ;;  %s3996_s2 = inlined_call_operand.vmem [shape: f32[512,4], index: 2, kind: input, shape index: {}]   ;;  %s3997_s3 = inlined_call_operand.vmem [shape: f32[512,4], index: 3, kind: input, shape index: {}]   ;;  %s3998_s4 = inlined_call_operand.vmem [shape: f32[16,128], index: 4, kind: input, shape index: {}]   ;;  %s3999_s5 = inlined_call_operand.vmem [shape: f32[1,128], index: 5, kind: input, shape index: {}]   ;;  %s4000_s6 = inlined_call_operand.vmem [shape: f32[128,128], index: 6, kind: input, shape index: {}]   ;;  %s4001_s7 = inlined_call_operand.vmem [shape: f32[1,128], index: 7, kind: input, shape index: {}]   ;;  %s4002_s8 = inlined_call_operand.vmem [shape: f32[128,4], index: 8, kind: input, shape index: {}]   ;;  %s4003_s9 = inlined_call_operand.vmem [shape: f32[1,4], index: 9, kind: input, shape index: {}]   ;;  %s4004_s10 = inlined_call_operand.vmem [shape: f32[1,4], index: 10, kind: input, shape index: {}]   ;;  %s4005_s11 = inlined_call_operand.vmem [shape: f32[1,4], index: 11, kind: input, shape index: {}]   ;;  %s4006_s12 = inlined_call_operand.vmem [shape: f32[512,128], index: 12, kind: output, shape index: {}]  }
   0x1   :  { %17 = sst [smem:[#allocation2]] %s3994_s0 }
   0x2 LB: > { %s2190_s24 = sadd.s32 4294967295, %s2823_s23   ;;  %p2194_p0 = scmp.ge.s32.totalorder %s2823_s23, 1  ;;  %s2823_s23 = sphi %s2893_s23, %s23_s23  }
   0x3   : > { %p386_p1 = scmp.lt.s32.totalorder %s2823_s23, 3 }
   0x5   : > { %p387_p2 = pnand %p2194_p0, %p386_p1 }
   0x7   : > { %390 = sbr.rel (%p387_p2) target bundleno = 907 (0x38b), region = 68 }
   0xe   : > { %v494_v0 = vld [vmem:[%s3998_s4] sm:$0xff]  ;;  %v495_v1 = vld [vmem:[%s3998_s4 + $0x8] sm:$0xff]  ;;  %s2195_s28 = sshll.u32 %s2190_s24, 5  ;;  %vm503_vm0 = vcmask 130048   ;;  %v859_v9 = vld [vmem:[%s4000_s6 + $0x10] sm:$0xff]  ;;  %vm1553_vm1 = vcmask 31744  }
   0xf   : > { %v857_v2 = vld [vmem:[%s4000_s6] sm:$0xff]  ;;  %v2584_v3 = vpack.c.bf16 %v495_v1, %v494_v0  ;;  %p439_p3 = scmp.lt.s32.totalorder %s2195_s28, 63  ;;  %v858_v4 = vld [vmem:[%s4000_s6 + $0x8] sm:$0xff]  ;;  %v860_v10 = vld [vmem:[%s4000_s6 + $0x18] sm:$0xff]  ;;  %s1449_s27 = sld [smem:[#allocation2]] }
  0x10   : > { %v2588_v5 = vpack.c.bf16 %v858_v4, %v857_v2  ;;  %v2592_v15 = vpack.c.bf16 %v860_v10, %v859_v9  ;;  %v861_v17 = vld [vmem:[%s4000_s6 + $0x20] sm:$0xff]  ;;  %v862_v18 = vld [vmem:[%s4000_s6 + $0x28] sm:$0xff]  ;;  %v863_v24 = vld [vmem:[%s4000_s6 + $0x30] sm:$0xff] }
  0x11   : > { %2585 = vmatprep.subr.bf16.mxu0 %v2584_v3  ;;  %s4049_s28 = smov (!%p439_p3, %s2195_s28), 63  ;;  %2652 = vmatprep.subr.bf16.mxu1 %v2584_v3  ;;  %v2596_v23 = vpack.c.bf16 %v862_v18, %v861_v17  ;;  %v864_v25 = vld [vmem:[%s4000_s6 + $0x38] sm:$0xff]  ;;  %v865_v31 = vld [vmem:[%s4000_s6 + $0x40] sm:$0xff]  ;;  %v866_v32 = vld [vmem:[%s4000_s6 + $0x48] sm:$0xff] }
  0x12   : > { %2587 = vmatpush3.bf16.msra.mxu0 %v2584_v3  ;;  %2653 = vmatpush3.bf16.msra.mxu1 %v2584_v3  ;;  %s2913_s15 = sshll.u32 %s4049_s28, 3  ;;  %v2600_v30 = vpack.c.bf16 %v864_v25, %v863_v24  ;;  %v2604_v37 = vpack.c.bf16 %v866_v32, %v865_v31  ;;  %v867_v50 = vld [vmem:[%s4000_s6 + $0x50] sm:$0xff]  ;;  %v868_v51 = vld [vmem:[%s4000_s6 + $0x58] sm:$0xff]  ;;  %v869_v53 = vld [vmem:[%s4000_s6 + $0x60] sm:$0xff] }
  0x13   : > { %2589 = vmatprep.subr.bf16.mxu1 %v2588_v5  ;;  %s2919_s18 = scalar_lea.vmem %s3995_s1, %s2913_s15  ;;  %v2608_v52 = vpack.c.bf16 %v868_v51, %v867_v50  ;;  %v870_v54 = vld [vmem:[%s4000_s6 + $0x68] sm:$0xff]  ;;  %v871_v56 = vld [vmem:[%s4000_s6 + $0x70] sm:$0xff]  ;;  %v872_v57 = vld [vmem:[%s4000_s6 + $0x78] sm:$0xff]  ;;  %s3140_s14 = scalar_lea.vmem %s3997_s3, %s2913_s15 }
  0x14   : > { %v462_v6 = vld [vmem:[%s2919_s18] sm:$0xff]  ;;  %v463_v7 = vld [vmem:[%s2919_s18 + $0x8] sm:$0xff]  ;;  %v464_v8 = vld [vmem:[%s2919_s18 + $0x10] sm:$0xff]  ;;  %v2612_v55 = vpack.c.bf16 %v870_v54, %v869_v53  ;;  %v2616_v58 = vpack.c.bf16 %v872_v57, %v871_v56  ;;  %s3276_s24 = scalar_lea.vmem %s3996_s2, %s2913_s15  ;;  %s3590_s30 = scalar_lea.vmem %s4006_s12, %s2913_s15 }
  0x15   : > { %2376 = vmatprep.mubr.msk.f32.mxu0 %vm503_vm0, %v462_v6  ;;  %v465_v11 = vld [vmem:[%s2919_s18 + $0x18] sm:$0xff]  ;;  %v466_v12 = vld [vmem:[%s2919_s18 + $0x20] sm:$0xff]  ;;  %v479_v14 = vld [vmem:[%s2919_s18 + $0x88] sm:$0xff] }
  0x16   : > { %2377 = vmatmul.mubr.msk.f32.vlgmr.msra.gmra.mrb[0].mxu0 %vm503_vm0, %v463_v7  ;;  %v478_v13 = vld [vmem:[%s2919_s18 + $0x80] sm:$0xff]  ;;  %v480_v16 = vld [vmem:[%s2919_s18 + $0x90] sm:$0xff]  ;;  %v467_v19 = vld [vmem:[%s2919_s18 + $0x28] sm:$0xff] }
  0x17   : > { %2379 = vmatprep.mubr.msk.f32.mxu0 %vm503_vm0, %v464_v8  ;;  %2400 = vmatprep.mubr.msk.f32.mxu1 %vm503_vm0, %v478_v13  ;;  %v468_v20 = vld [vmem:[%s2919_s18 + $0x30] sm:$0xff]  ;;  %v481_v21 = vld [vmem:[%s2919_s18 + $0x98] sm:$0xff]  ;;  %v482_v22 = vld [vmem:[%s2919_s18 + $0xa0] sm:$0xff] }
  0x18   : > { %2401 = vmatmul.mubr.msk.f32.vlgmr.msra.gmra.mrb[0].mxu1 %vm503_vm0, %v479_v14  ;;  %v469_v26 = vld [vmem:[%s2919_s18 + $0x38] sm:$0xff]  ;;  %v470_v27 = vld [vmem:[%s2919_s18 + $0x40] sm:$0xff]  ;;  %v483_v28 = vld [vmem:[%s2919_s18 + $0xa8] sm:$0xff] }
  0x19   : > { %2403 = vmatprep.mubr.msk.f32.mxu1 %vm503_vm0, %v480_v16  ;;  %2591 = vmatpush3.bf16.msra.mxu1 %v2588_v5  ;;  %v484_v29 = vld [vmem:[%s2919_s18 + $0xb0] sm:$0xff]  ;;  %v471_v33 = vld [vmem:[%s2919_s18 + $0x48] sm:$0xff]  ;;  %v485_v35 = vld [vmem:[%s2919_s18 + $0xb8] sm:$0xff] }
  0x1a   : > { %2380 = vmatmul.mubr.msk.f32.gmra.mrb[2].mxu0 %vm503_vm0, %v465_v11  ;;  %2593 = vmatprep.subr.bf16.mxu1 %v2592_v15  ;;  %v472_v34 = vld [vmem:[%s2919_s18 + $0x50] sm:$0xff]  ;;  %v486_v36 = vld [vmem:[%s2919_s18 + $0xc0] sm:$0xff]  ;;  %v473_v38 = vld [vmem:[%s2919_s18 + $0x58] sm:$0xff] }
  0x1b   : > { %2382 = vmatprep.mubr.msk.f32.mxu0 %vm503_vm0, %v466_v12  ;;  %v474_v39 = vld [vmem:[%s2919_s18 + $0x60] sm:$0xff]  ;;  %v487_v40 = vld [vmem:[%s2919_s18 + $0xc8] sm:$0xff]  ;;  %v488_v41 = vld [vmem:[%s2919_s18 + $0xd0] sm:$0xff] }
  0x1c   : > { %2404 = vmatmul.mubr.msk.f32.gmra.mrb[2].mxu1 %vm503_vm0, %v481_v21  ;;  %v475_v42 = vld [vmem:[%s2919_s18 + $0x68] sm:$0xff]  ;;  %v476_v43 = vld [vmem:[%s2919_s18 + $0x70] sm:$0xff]  ;;  %v489_v44 = vld [vmem:[%s2919_s18 + $0xd8] sm:$0xff] }
  0x1d   : > { %2406 = vmatprep.mubr.msk.f32.mxu1 %vm503_vm0, %v482_v22  ;;  %2595 = vmatpush3.bf16.msra.mxu1 %v2592_v15  ;;  %v490_v45 = vld [vmem:[%s2919_s18 + $0xe0] sm:$0xff]  ;;  %v477_v46 = vld [vmem:[%s2919_s18 + $0x78] sm:$0xff]  ;;  %v491_v47 = vld [vmem:[%s2919_s18 + $0xe8] sm:$0xff] }
  0x1e   : > { %2383 = vmatmul.mubr.msk.f32.gmra.mrb[4].mxu0 %vm503_vm0, %v467_v19  ;;  %2597 = vmatprep.subr.bf16.mxu1 %v2596_v23  ;;  %v492_v48 = vld [vmem:[%s2919_s18 + $0xf0] sm:$0xff]  ;;  %v493_v49 = vld [vmem:[%s2919_s18 + $0xf8] sm:$0xff]  ;;  %v1137_v59 = vld [vmem:[%s4002_s8] sm:$0xff] }
  0x1f   : > { %2385 = vmatprep.mubr.msk.f32.mxu0 %vm503_vm0, %v468_v20  ;;  %v1138_v60 = vld [vmem:[%s4002_s8 + $0x8] sm:$0xff]  ;;  %v1139_v61 = vld [vmem:[%s4002_s8 + $0x10] sm:$0xff]  ;;  %v1140_v63 = vld [vmem:[%s4002_s8 + $0x18] sm:$0xff] }
  0x20   : > { %2407 = vmatmul.mubr.msk.f32.gmra.mrb[4].mxu1 %vm503_vm0, %v483_v28  ;;  %v2620_v62 = vpack.c.bf16 %v1138_v60, %v1137_v59  ;;  %v2624_v0 = vpack.c.bf16 %v1140_v63, %v1139_v61  ;;  %v1141_v1 = vld [vmem:[%s4002_s8 + $0x20] sm:$0xff]  ;;  %v1142_v2 = vld [vmem:[%s4002_s8 + $0x28] sm:$0xff]  ;;  %v1143_v4 = vld [vmem:[%s4002_s8 + $0x30] sm:$0xff] }
  0x21   : > { %2409 = vmatprep.mubr.msk.f32.mxu1 %vm503_vm0, %v484_v29  ;;  %2599 = vmatpush3.bf16.msra.mxu1 %v2596_v23  ;;  %v2628_v3 = vpack.c.bf16 %v1142_v2, %v1141_v1  ;;  %v1144_v5 = vld [vmem:[%s4002_s8 + $0x38] sm:$0xff]  ;;  %v1145_v7 = vld [vmem:[%s4002_s8 + $0x40] sm:$0xff]  ;;  %v1146_v8 = vld [vmem:[%s4002_s8 + $0x48] sm:$0xff] }
  0x22   : > { %2386 = vmatmul.mubr.msk.f32.gmra.mrb[6].mxu0 %vm503_vm0, %v469_v26  ;;  %2601 = vmatprep.subr.bf16.mxu1 %v2600_v30  ;;  %v2632_v6 = vpack.c.bf16 %v1144_v5, %v1143_v4  ;;  %v2636_v9 = vpack.c.bf16 %v1146_v8, %v1145_v7  ;;  %v3060_v10 = vld [vmem:[%s3999_s5] ss:$0 sm:$0xff] }
  0x23   : > { %2388 = vmatprep.mubr.msk.f32.mxu0 %vm503_vm0, %v470_v27  ;;  %2621 = vmatprep.subr.bf16.mxu0 %v2620_v62 }
  0x24   : > { %2410 = vmatmul.mubr.msk.f32.gmra.mrb[6].mxu1 %vm503_vm0, %v485_v35  ;;  %2623 = vmatpush3.bf16.msra.mxu0 %v2620_v62 }
  0x25   : > { %2412 = vmatprep.mubr.msk.f32.mxu1 %vm503_vm0, %v486_v36  ;;  %2603 = vmatpush3.bf16.msra.mxu1 %v2600_v30 }
  0x26   : > { %2389 = vmatmul.mubr.msk.f32.gmra.mrb[8].mxu0 %vm503_vm0, %v471_v33  ;;  %2605 = vmatprep.subr.bf16.mxu1 %v2604_v37 }
  0x27   : > { %2391 = vmatprep.mubr.msk.f32.mxu0 %vm503_vm0, %v472_v34  ;;  %2625 = vmatprep.subr.bf16.mxu0 %v2624_v0 }
  0x28   : > { %2413 = vmatmul.mubr.msk.f32.gmra.mrb[8].mxu1 %vm503_vm0, %v487_v40  ;;  %2627 = vmatpush3.bf16.msra.mxu0 %v2624_v0 }
  0x29   : > { %2415 = vmatprep.mubr.msk.f32.mxu1 %vm503_vm0, %v488_v41  ;;  %2607 = vmatpush3.bf16.msra.mxu1 %v2604_v37 }
  0x2a   : > { %2392 = vmatmul.mubr.msk.f32.gmra.mrb[10].mxu0 %vm503_vm0, %v473_v38  ;;  %2609 = vmatprep.subr.bf16.mxu1 %v2608_v52 }
  0x2b   : > { %2394 = vmatprep.mubr.msk.f32.mxu0 %vm503_vm0, %v474_v39  ;;  %2629 = vmatprep.subr.bf16.mxu0 %v2628_v3 }
  0x2c   : > { %2416 = vmatmul.mubr.msk.f32.gmra.mrb[10].mxu1 %vm503_vm0, %v489_v44  ;;  %2631 = vmatpush3.bf16.msra.mxu0 %v2628_v3 }
  0x2d   : > { %2418 = vmatprep.mubr.msk.f32.mxu1 %vm503_vm0, %v490_v45  ;;  %2611 = vmatpush3.bf16.msra.mxu1 %v2608_v52 }
  0x2e   : > { %2395 = vmatmul.mubr.msk.f32.gmra.mrb[12].mxu0 %vm503_vm0, %v475_v42  ;;  %2613 = vmatprep.subr.bf16.mxu1 %v2612_v55 }
  0x2f   : > { %2397 = vmatprep.mubr.msk.f32.mxu0 %vm503_vm0, %v476_v43  ;;  %2633 = vmatprep.subr.bf16.mxu0 %v2632_v6 }
  0x30   : > { %2419 = vmatmul.mubr.msk.f32.gmra.mrb[12].mxu1 %vm503_vm0, %v491_v47  ;;  %2635 = vmatpush3.bf16.msra.mxu0 %v2632_v6 }
  0x31   : > { %2421 = vmatprep.mubr.msk.f32.mxu1 %vm503_vm0, %v492_v48  ;;  %2615 = vmatpush3.bf16.msra.mxu1 %v2612_v55 }
  0x32   : > { %2398 = vmatmul.mubr.msk.f32.gmra.mrb[14].mxu0 %vm503_vm0, %v477_v46  ;;  %2617 = vmatprep.subr.bf16.mxu1 %v2616_v58 }
  0x33   : > { %2637 = vmatprep.subr.bf16.mxu0 %v2636_v9 }
  0x34   : > { %2422 = vmatmul.mubr.msk.f32.gmra.mrb[14].mxu1 %vm503_vm0, %v493_v49  ;;  %2639 = vmatpush3.bf16.msra.mxu0 %v2636_v9 }
  0x35   : > { %2619 = vmatpush3.bf16.msra.mxu1 %v2616_v58 }
  0xe9   : > { %v2378_v11 = vpop.f32.mrb[0].mxu0 }
  0xea   : > { %v672_v12 = vadd.f32 %v2378_v11, %v3060_v10  ;;  %v666_v13 = vpop.f32.mrb[1].mxu0 }
  0xeb   : > { %v667_v14 = vadd.f32 %v3060_v10, %v666_v13  ;;  %v3065_v18 = vpop.f32.mrb[0].mxu1 }
  0xec   : > { %v746_v20 = vpop.f32.mrb[1].mxu1  ;;  %v752_v5 = vadd.f32 %v3065_v18, %v3060_v10 }
  0xed   : > { %2662 = vtanh.f32 %v667_v14  ;;  %v2381_v15 = vpop.f32.mrb[2].mxu0  ;;  %v747_v59 = vadd.f32 %v3060_v10, %v746_v20 }
  0xee   : > { %2664 = vtanh.f32 %v672_v12  ;;  %v682_v16 = vadd.f32 %v2381_v15, %v3060_v10  ;;  %v676_v17 = vpop.f32.mrb[3].mxu0 }
  0xef   : > { %v677_v19 = vadd.f32 %v3060_v10, %v676_v17  ;;  %v3069_v24 = vpop.f32.mrb[2].mxu1 }
  0xf0   : > { %v3072_v26 = vpop.f32.mrb[3].mxu1  ;;  %v762_v12 = vadd.f32 %v3069_v24, %v3060_v10 }
  0xf1   : > { %2666 = vtanh.f32 %v677_v19  ;;  %v2384_v21 = vpop.f32.mrb[4].mxu0  ;;  %v757_v4 = vadd.f32 %v3060_v10, %v3072_v26 }
  0xf2   : > { %2668 = vtanh.f32 %v682_v16  ;;  %v692_v22 = vadd.f32 %v2384_v21, %v3060_v10  ;;  %v686_v23 = vpop.f32.mrb[5].mxu0 }
  0xf3   : > { %v687_v25 = vadd.f32 %v3060_v10, %v686_v23  ;;  %v3075_v30 = vpop.f32.mrb[4].mxu1 }
  0xf4   : > { %v3078_v33 = vpop.f32.mrb[5].mxu1  ;;  %v772_v17 = vadd.f32 %v3075_v30, %v3060_v10 }
  0xf5   : > { %2670 = vtanh.f32 %v687_v25  ;;  %v2387_v27 = vpop.f32.mrb[6].mxu0  ;;  %v767_v11 = vadd.f32 %v3060_v10, %v3078_v33 }
  0xf6   : > { %2672 = vtanh.f32 %v692_v22  ;;  %v702_v28 = vadd.f32 %v2387_v27, %v3060_v10  ;;  %v696_v29 = vpop.f32.mrb[7].mxu0 }
  0xf7   : > { %v2663_v31 = vpop.eup %2662  ;;  %v697_v32 = vadd.f32 %v3060_v10, %v696_v29  ;;  %v3081_v38 = vpop.f32.mrb[6].mxu1 }
  0xf8   : > { %v2665_v34 = vpop.eup %2664  ;;  %2456 = vmatprep.mubr.f32.mxu1 %v2663_v31  ;;  %v776_v41 = vpop.f32.mrb[7].mxu1  ;;  %v782_v21 = vadd.f32 %v3081_v38, %v3060_v10 }
  0xf9   : > { %2674 = vtanh.f32 %v697_v32  ;;  %v2390_v35 = vpop.f32.mrb[8].mxu0  ;;  %2457 = vmatmul.mubr.f32.vlgmr.msra.gmra.mrb[16].mxu1 %v2665_v34  ;;  %v777_v15 = vadd.f32 %v3060_v10, %v776_v41 }
  0xfa   : > { %2676 = vtanh.f32 %v702_v28  ;;  %v712_v36 = vadd.f32 %v2390_v35, %v3060_v10  ;;  %v706_v37 = vpop.f32.mrb[9].mxu0 }
  0xfb   : > { %v2667_v39 = vpop.eup %2666  ;;  %v707_v40 = vadd.f32 %v3060_v10, %v706_v37  ;;  %v3085_v46 = vpop.f32.mrb[8].mxu1 }
  0xfc   : > { %v2669_v42 = vpop.eup %2668  ;;  %2459 = vmatprep.mubr.f32.mxu1 %v2667_v39  ;;  %v786_v49 = vpop.f32.mrb[9].mxu1  ;;  %v792_v25 = vadd.f32 %v3085_v46, %v3060_v10  ;;  %v1149_v46 = vld [vmem:[%s4002_s8 + $0x60] sm:$0xff] }
  0xfd   : > { %2678 = vtanh.f32 %v707_v40  ;;  %v2393_v43 = vpop.f32.mrb[10].mxu0  ;;  %2460 = vmatmul.mubr.f32.gmra.mrb[18].mxu1 %v2669_v42  ;;  %v787_v20 = vadd.f32 %v3060_v10, %v786_v49  ;;  %v1151_v49 = vld [vmem:[%s4002_s8 + $0x70] sm:$0xff] }
  0xfe   : > { %2680 = vtanh.f32 %v712_v36  ;;  %v722_v44 = vadd.f32 %v2393_v43, %v3060_v10  ;;  %v716_v45 = vpop.f32.mrb[11].mxu0 }
  0xff   : > { %v2671_v47 = vpop.eup %2670  ;;  %v717_v48 = vadd.f32 %v3060_v10, %v716_v45  ;;  %v3089_v54 = vpop.f32.mrb[10].mxu1 }
 0x100   : > { %v2673_v50 = vpop.eup %2672  ;;  %2462 = vmatprep.mubr.f32.mxu1 %v2671_v47  ;;  %v796_v57 = vpop.f32.mrb[11].mxu1  ;;  %v802_v29 = vadd.f32 %v3089_v54, %v3060_v10  ;;  %v1150_v47 = vld [vmem:[%s4002_s8 + $0x68] sm:$0xff]  ;;  %v1388_v54 = vld [vmem:[%s3140_s14 + $0x18] sm:$0xff] }
 0x101   : > { %2682 = vtanh.f32 %v717_v48  ;;  %v2396_v51 = vpop.f32.mrb[12].mxu0  ;;  %2463 = vmatmul.mubr.f32.gmra.mrb[20].mxu1 %v2673_v50  ;;  %v797_v24 = vadd.f32 %v3060_v10, %v796_v57  ;;  %v2644_v48 = vpack.c.bf16 %v1150_v47, %v1149_v46  ;;  %v1152_v50 = vld [vmem:[%s4002_s8 + $0x78] sm:$0xff]  ;;  %v1386_v57 = vld [vmem:[%s3140_s14 + $0x8] sm:$0xff]  ;;  %v1405_v47 = vld [vmem:[%s3140_s14 + $0xa0] sm:$0xff] }
 0x102   : > { %2684 = vtanh.f32 %v722_v44  ;;  %v732_v52 = vadd.f32 %v2396_v51, %v3060_v10  ;;  %v726_v53 = vpop.f32.mrb[13].mxu0  ;;  %v1148_v44 = vld [vmem:[%s4002_s8 + $0x58] sm:$0xff]  ;;  %v2648_v51 = vpack.c.bf16 %v1152_v50, %v1151_v49  ;;  %v1406_v46 = vld [vmem:[%s3140_s14 + $0xa8] sm:$0xff] }
 0x103   : > { %v2675_v55 = vpop.eup %2674  ;;  %v727_v56 = vadd.f32 %v3060_v10, %v726_v53  ;;  %v2420_v63 = vpop.f32.mrb[12].mxu1  ;;  %v3146_v53 = vld [vmem:[%s3140_s14] sm:$0xff]  ;;  %v1542_v50 = vmul.f32 %v1406_v46, %v1406_v46 }
 0x104   : > { %v2677_v58 = vpop.eup %2676  ;;  %2465 = vmatprep.mubr.f32.mxu1 %v2675_v55  ;;  %v806_v2 = vpop.f32.mrb[13].mxu1  ;;  %v812_v33 = vadd.f32 %v2420_v63, %v3060_v10 }
 0x105   : > { %2686 = vtanh.f32 %v727_v56  ;;  %v2399_v60 = vpop.f32.mrb[14].mxu0  ;;  %2466 = vmatmul.mubr.f32.gmra.mrb[22].mxu1 %v2677_v58  ;;  %v807_v28 = vadd.f32 %v3060_v10, %v806_v2  ;;  %v1521_v56 = vmul.f32 %v3146_v53, %v3146_v53  ;;  %v1524_v58 = vmul.f32 %v1388_v54, %v1388_v54  ;;  %v1408_v54 = vld [vmem:[%s3140_s14 + $0xb8] sm:$0xff] }
 0x106   : > { %2688 = vtanh.f32 %v732_v52  ;;  %v742_v61 = vadd.f32 %v2399_v60, %v3060_v10  ;;  %v736_v62 = vpop.f32.mrb[15].mxu0  ;;  %v3143_v52 = vld [vmem:[%s3140_s14 + $0x10] sm:$0xff]  ;;  %v1390_v60 = vld [vmem:[%s3140_s14 + $0x28] sm:$0xff] }
 0x107   : > { %v2679_v0 = vpop.eup %2678  ;;  %v737_v1 = vadd.f32 %v3060_v10, %v736_v62  ;;  %2690 = vtanh.f32 %v747_v59  ;;  %v2423_v6 = vpop.f32.mrb[14].mxu1  ;;  %v1523_v55 = vmul.f32 %v3143_v52, %v3143_v52  ;;  %v1522_v59 = vmul.f32 %v1386_v57, %v1386_v57 }
 0x108   : > { %v2681_v3 = vpop.eup %2680  ;;  %2468 = vmatprep.mubr.f32.mxu1 %v2679_v0  ;;  %v816_v8 = vpop.f32.mrb[15].mxu1  ;;  %v822_v36 = vadd.f32 %v2423_v6, %v3060_v10  ;;  %v1554_v63 = vsel %vm1553_vm1, %v1521_v56, 0.0  ;;  %v1563_v0 = vsel %vm1553_vm1, %v1524_v58, 0.0  ;;  %v1526_v2 = vmul.f32 %v1390_v60, %v1390_v60  ;;  %v1410_v60 = vld [vmem:[%s3140_s14 + $0xc8] sm:$0xff] }
 0x109   : > { %2692 = vtanh.f32 %v737_v1  ;;  %2469 = vmatmul.mubr.f32.gmra.mrb[24].mxu1 %v2681_v3  ;;  %v817_v32 = vadd.f32 %v3060_v10, %v816_v8  ;;  %v1147_v10 = vld [vmem:[%s4002_s8 + $0x50] sm:$0xff]  ;;  %v1560_v62 = vsel %vm1553_vm1, %v1523_v55, 0.0  ;;  %1555 = vadd.xlane.f32.xlu0 %v1554_v63  ;;  %v1557_v1 = vsel %vm1553_vm1, %v1522_v59, 0.0 }
 0x10a   : > { %2694 = vtanh.f32 %v742_v61  ;;  %v2640_v45 = vpack.c.bf16 %v1148_v44, %v1147_v10  ;;  %v1389_v61 = vld [vmem:[%s3140_s14 + $0x20] sm:$0xff]  ;;  %1561 = vadd.xlane.f32.xlu1 %v1560_v62  ;;  %v1569_v6 = vsel %vm1553_vm1, %v1526_v2, 0.0  ;;  %v1407_v55 = vld [vmem:[%s3140_s14 + $0xb0] sm:$0xff]  ;;  %v1617_v56 = vsel %vm1553_vm1, %v1542_v50, 0.0  ;;  %v1412_v2 = vld [vmem:[%s3140_s14 + $0xd8] sm:$0xff] }
 0x10b   : > { %v2683_v7 = vpop.eup %2682  ;;  %2696 = vtanh.f32 %v757_v4  ;;  %v1525_v3 = vmul.f32 %v1389_v61, %v1389_v61  ;;  %v1392_v4 = vld [vmem:[%s3140_s14 + $0x38] sm:$0xff]  ;;  %v1544_v58 = vmul.f32 %v1408_v54, %v1408_v54  ;;  %v1543_v59 = vmul.f32 %v1407_v55, %v1407_v55  ;;  %v1409_v61 = vld [vmem:[%s3140_s14 + $0xc0] sm:$0xff] }
 0x10c   : > { %v2685_v9 = vpop.eup %2684  ;;  %2471 = vmatprep.mubr.f32.mxu1 %v2683_v7  ;;  %2698 = vtanh.f32 %v752_v5  ;;  %2641 = vmatprep.subr.bf16.mxu0 %v2640_v45  ;;  %v1391_v5 = vld [vmem:[%s3140_s14 + $0x30] sm:$0xff]  ;;  %v1528_v8 = vmul.f32 %v1392_v4, %v1392_v4  ;;  %v3205_v4 = vld [vmem:[%s4001_s7] ss:$0 sm:$0xff] }
 0x10d   : > { %2472 = vmatmul.mubr.f32.gmra.mrb[26].mxu1 %v2685_v9  ;;  %2700 = vtanh.f32 %v767_v11  ;;  %2643 = vmatpush3.bf16.msra.mxu0 %v2640_v45  ;;  %v1566_v7 = vsel %vm1553_vm1, %v1525_v3, 0.0  ;;  %v1527_v9 = vmul.f32 %v1391_v5, %v1391_v5  ;;  %v1394_v11 = vld [vmem:[%s3140_s14 + $0x48] sm:$0xff]  ;;  %v1623_v62 = vsel %vm1553_vm1, %v1544_v58, 0.0  ;;  %v1411_v3 = vld [vmem:[%s3140_s14 + $0xd0] sm:$0xff] }
 0x10e   : > { %2702 = vtanh.f32 %v762_v12  ;;  %2645 = vmatprep.subr.bf16.mxu0 %v2644_v48  ;;  %1564 = vadd.xlane.f32.xlu1 %v1563_v0  ;;  %v1393_v12 = vld [vmem:[%s3140_s14 + $0x40] sm:$0xff]  ;;  %v1620_v63 = vsel %vm1553_vm1, %v1543_v59, 0.0  ;;  %v1546_v0 = vmul.f32 %v1410_v60, %v1410_v60 }
 0x10f   : > { %v2687_v13 = vpop.eup %2686  ;;  %2704 = vtanh.f32 %v777_v15  ;;  %1558 = vadd.xlane.f32.xlu0 %v1557_v1  ;;  %v1530_v15 = vmul.f32 %v1394_v11, %v1394_v11  ;;  %v1545_v1 = vmul.f32 %v1409_v61, %v1409_v61 }
 0x110   : > { %v2689_v14 = vpop.eup %2688  ;;  %2474 = vmatprep.mubr.f32.mxu1 %v2687_v13  ;;  %2706 = vtanh.f32 %v772_v17  ;;  %v1575_v13 = vsel %vm1553_vm1, %v1528_v8, 0.0  ;;  %v1396_v17 = vld [vmem:[%s3140_s14 + $0x58] sm:$0xff]  ;;  %v1629_v5 = vsel %vm1553_vm1, %v1546_v0, 0.0  ;;  %v1547_v8 = vmul.f32 %v1411_v3, %v1411_v3 }
 0x111   : > { %2475 = vmatmul.mubr.f32.gmra.mrb[28].mxu1 %v2689_v14  ;;  %v2691_v16 = vpop.eup %2690  ;;  %2708 = vtanh.f32 %v787_v20  ;;  %2647 = vmatpush3.bf16.msra.mxu0 %v2644_v48  ;;  %v1572_v14 = vsel %vm1553_vm1, %v1527_v9, 0.0 }
 0x112   : > { %2710 = vtanh.f32 %v782_v21  ;;  %2649 = vmatprep.subr.bf16.mxu0 %v2648_v51  ;;  %1570 = vadd.xlane.f32.xlu1 %v1569_v6  ;;  %v1532_v21 = vmul.f32 %v1396_v17, %v1396_v17  ;;  %v1626_v6 = vsel %vm1553_vm1, %v1545_v1, 0.0 }
 0x113   : > { %v2693_v18 = vpop.eup %2692  ;;  %2712 = vtanh.f32 %v797_v24  ;;  %1567 = vadd.xlane.f32.xlu0 %v1566_v7  ;;  %v1397_v24 = vld [vmem:[%s3140_s14 + $0x60] sm:$0xff]  ;;  %v1548_v7 = vmul.f32 %v1412_v2, %v1412_v2 }
 0x114   : > { %v2695_v19 = vpop.eup %2694  ;;  %2477 = vmatprep.mubr.f32.mxu1 %v2693_v18  ;;  %2714 = vtanh.f32 %v792_v25  ;;  %v1395_v18 = vld [vmem:[%s3140_s14 + $0x50] sm:$0xff]  ;;  %v1587_v25 = vsel %vm1553_vm1, %v1532_v21, 0.0 }
 0x115   : > { %2478 = vmatmul.mubr.f32.gmra.mrb[30].mxu1 %v2695_v19  ;;  %v2697_v22 = vpop.eup %2696  ;;  %2716 = vtanh.f32 %v807_v28  ;;  %2651 = vmatpush3.bf16.msra.mxu0 %v2648_v51  ;;  %v1581_v19 = vsel %vm1553_vm1, %v1530_v15, 0.0  ;;  %v1533_v28 = vmul.f32 %v1397_v24, %v1397_v24  ;;  %v1541_v51 = vmul.f32 %v1405_v47, %v1405_v47 }
 0x116   : > { %2480 = vmatprep.mubr.f32.mxu1 %v2691_v16  ;;  %v2699_v23 = vpop.eup %2698  ;;  %2718 = vtanh.f32 %v802_v29  ;;  %v1529_v16 = vmul.f32 %v1393_v12, %v1393_v12  ;;  %1576 = vadd.xlane.f32.xlu1 %v1575_v13  ;;  %v1400_v29 = vld [vmem:[%s3140_s14 + $0x78] sm:$0xff]  ;;  %v1632_v15 = vsel %vm1553_vm1, %v1547_v8, 0.0 }
 0x117   : > { %v2701_v26 = vpop.eup %2700  ;;  %2720 = vtanh.f32 %v817_v32  ;;  %1573 = vadd.xlane.f32.xlu0 %v1572_v14  ;;  %v1590_v32 = vsel %vm1553_vm1, %v1533_v28, 0.0  ;;  %v1614_v57 = vsel %vm1553_vm1, %v1541_v51, 0.0  ;;  %v1635_v14 = vsel %vm1553_vm1, %v1548_v7, 0.0 }
 0x118   : > { %v2703_v27 = vpop.eup %2702  ;;  %2722 = vtanh.f32 %v812_v33  ;;  %v1578_v20 = vsel %vm1553_vm1, %v1529_v16, 0.0  ;;  %v1536_v33 = vmul.f32 %v1400_v29, %v1400_v29 }
 0x119   : > { %2481 = vmatmul.mubr.f32.gmra.mrb[32].mxu1 %v2699_v23  ;;  %v2705_v30 = vpop.eup %2704  ;;  %2724 = vtanh.f32 %v822_v36  ;;  %v1398_v23 = vld [vmem:[%s3140_s14 + $0x68] sm:$0xff]  ;;  %v1401_v36 = vld [vmem:[%s3140_s14 + $0x80] sm:$0xff] }
 0x11a   : > { %2483 = vmatprep.mubr.f32.mxu1 %v2697_v22  ;;  %v2707_v31 = vpop.eup %2706  ;;  %v1531_v22 = vmul.f32 %v1395_v18, %v1395_v18  ;;  %1582 = vadd.xlane.f32.xlu1 %v1581_v19 }
 0x11b   : > { %v2709_v34 = vpop.eup %2708  ;;  %1579 = vadd.xlane.f32.xlu0 %v1578_v20 }
 0x11c   : > { %v2711_v35 = vpop.eup %2710 }
 0x11d   : > { %2484 = vmatmul.mubr.f32.gmra.mrb[34].mxu1 %v2703_v27  ;;  %v2713_v37 = vpop.eup %2712  ;;  %v1534_v27 = vmul.f32 %v1398_v23, %v1398_v23 }
 0x11e   : > { %2486 = vmatprep.mubr.f32.mxu1 %v2701_v26  ;;  %v2715_v38 = vpop.eup %2714  ;;  %v1584_v26 = vsel %vm1553_vm1, %v1531_v22, 0.0  ;;  %1588 = vadd.xlane.f32.xlu1 %v1587_v25 }
 0x11f   : > { %v2717_v39 = vpop.eup %2716  ;;  %1585 = vadd.xlane.f32.xlu0 %v1584_v26 }
 0x120   : > { %v2719_v40 = vpop.eup %2718 }
 0x121   : > { %2487 = vmatmul.mubr.f32.gmra.mrb[36].mxu1 %v2707_v31  ;;  %v2721_v41 = vpop.eup %2720  ;;  %v1593_v31 = vsel %vm1553_vm1, %v1534_v27, 0.0 }
 0x122   : > { %2489 = vmatprep.mubr.f32.mxu1 %v2705_v30  ;;  %v2723_v42 = vpop.eup %2722  ;;  %v1399_v30 = vld [vmem:[%s3140_s14 + $0x70] sm:$0xff]  ;;  %1594 = vadd.xlane.f32.xlu1 %v1593_v31 }
 0x123   : > { %v2725_v43 = vpop.eup %2724  ;;  %1591 = vadd.xlane.f32.xlu0 %v1590_v32 }
 0x125   : > { %2490 = vmatmul.mubr.f32.gmra.mrb[38].mxu1 %v2711_v35  ;;  %v1402_v35 = vld [vmem:[%s3140_s14 + $0x88] sm:$0xff] }
 0x126   : > { %2492 = vmatprep.mubr.f32.mxu1 %v2709_v34  ;;  %v1535_v34 = vmul.f32 %v1399_v30, %v1399_v30 }
 0x129   : > { %2493 = vmatmul.mubr.f32.gmra.mrb[40].mxu1 %v2715_v38  ;;  %v1596_v38 = vsel %vm1553_vm1, %v1535_v34, 0.0 }
 0x12a   : > { %2495 = vmatprep.mubr.f32.mxu1 %v2713_v37  ;;  %v1599_v37 = vsel %vm1553_vm1, %v1536_v33, 0.0  ;;  %1597 = vadd.xlane.f32.xlu0 %v1596_v38 }
 0x12b   : > { %1600 = vadd.xlane.f32.xlu1 %v1599_v37 }
 0x12d   : > { %2496 = vmatmul.mubr.f32.gmra.mrb[42].mxu1 %v2719_v40  ;;  %v1537_v40 = vmul.f32 %v1401_v36, %v1401_v36 }
 0x12e   : > { %2498 = vmatprep.mubr.f32.mxu1 %v2717_v39  ;;  %v1538_v39 = vmul.f32 %v1402_v35, %v1402_v35 }
 0x12f   : > { %v1602_v10 = vsel %vm1553_vm1, %v1537_v40, 0.0 }
 0x130   : > { %1603 = vadd.xlane.f32.xlu0 %v1602_v10 }
 0x131   : > { %2499 = vmatmul.mubr.f32.gmra.mrb[44].mxu1 %v2723_v42  ;;  %v1403_v42 = vld [vmem:[%s3140_s14 + $0x90] sm:$0xff] }
 0x132   : > { %2501 = vmatprep.mubr.f32.mxu1 %v2721_v41  ;;  %v1404_v41 = vld [vmem:[%s3140_s14 + $0x98] sm:$0xff]  ;;  %v1539_v45 = vmul.f32 %v1403_v42, %v1403_v42 }
 0x133   : > { %v1540_v44 = vmul.f32 %v1404_v41, %v1404_v41 }
 0x134   : > { %v1608_v49 = vsel %vm1553_vm1, %v1539_v45, 0.0 }
 0x135   : > { %2502 = vmatmul.mubr.f32.gmra.mrb[46].mxu1 %v2725_v43  ;;  %v1605_v43 = vsel %vm1553_vm1, %v1538_v39, 0.0  ;;  %v1611_v48 = vsel %vm1553_vm1, %v1540_v44, 0.0  ;;  %1609 = vadd.xlane.f32.xlu0 %v1608_v49 }
 0x136   : > { %1606 = vadd.xlane.f32.xlu1 %v1605_v43 }
 0x139   : > { %1615 = vadd.xlane.f32.xlu0 %v1614_v57 }
 0x13a   : > { %1612 = vadd.xlane.f32.xlu1 %v1611_v48 }
 0x13d   : > { %1621 = vadd.xlane.f32.xlu0 %v1620_v63 }
 0x13e   : > { %1618 = vadd.xlane.f32.xlu1 %v1617_v56 }
 0x141   : > { %1627 = vadd.xlane.f32.xlu0 %v1626_v6 }
 0x142   : > { %1624 = vadd.xlane.f32.xlu1 %v1623_v62 }
 0x145   : > { %1633 = vadd.xlane.f32.xlu0 %v1632_v15 }
 0x146   : > { %1630 = vadd.xlane.f32.xlu1 %v1629_v5 }
 0x14a   : > { %1636 = vadd.xlane.f32.xlu1 %v1635_v14 }
 0x1cc   : > { %v2458_v9 = vpop.f32.mrb[16].mxu1 }
 0x1cd   : > { %v952_v11 = vadd.f32 %v2458_v9, %v3205_v4  ;;  %v946_v12 = vpop.f32.mrb[17].mxu1 }
 0x1ce   : > { %v947_v13 = vadd.f32 %v3205_v4, %v946_v12 }
 0x1d0   : > { %2726 = vtanh.f32 %v947_v13  ;;  %v2461_v16 = vpop.f32.mrb[18].mxu1 }
 0x1d1   : > { %2728 = vtanh.f32 %v952_v11  ;;  %v962_v17 = vadd.f32 %v2461_v16, %v3205_v4  ;;  %v956_v18 = vpop.f32.mrb[19].mxu1 }
 0x1d2   : > { %v957_v19 = vadd.f32 %v3205_v4, %v956_v18 }
 0x1d4   : > { %2730 = vtanh.f32 %v957_v19  ;;  %v2464_v20 = vpop.f32.mrb[20].mxu1 }
 0x1d5   : > { %2732 = vtanh.f32 %v962_v17  ;;  %v972_v21 = vadd.f32 %v2464_v20, %v3205_v4  ;;  %v966_v22 = vpop.f32.mrb[21].mxu1 }
 0x1d6   : > { %v967_v23 = vadd.f32 %v3205_v4, %v966_v22 }
 0x1d8   : > { %2734 = vtanh.f32 %v967_v23  ;;  %v2467_v24 = vpop.f32.mrb[22].mxu1 }
 0x1d9   : > { %2736 = vtanh.f32 %v972_v21  ;;  %v982_v25 = vadd.f32 %v2467_v24, %v3205_v4  ;;  %v976_v26 = vpop.f32.mrb[23].mxu1 }
 0x1da   : > { %v2727_v27 = vpop.eup %2726  ;;  %v977_v28 = vadd.f32 %v3205_v4, %v976_v26 }
 0x1db   : > { %v2729_v29 = vpop.eup %2728  ;;  %2536 = vmatprep.mubr.f32.mxu0 %v2727_v27 }
 0x1dc   : > { %2738 = vtanh.f32 %v977_v28  ;;  %v2470_v30 = vpop.f32.mrb[24].mxu1  ;;  %2537 = vmatmul.mubr.f32.vlgmr.msra.gmra.mrb[16].mxu0 %v2729_v29 }
 0x1dd   : > { %2740 = vtanh.f32 %v982_v25  ;;  %v992_v31 = vadd.f32 %v2470_v30, %v3205_v4  ;;  %v986_v32 = vpop.f32.mrb[25].mxu1 }
 0x1de   : > { %v2731_v33 = vpop.eup %2730  ;;  %v987_v34 = vadd.f32 %v3205_v4, %v986_v32 }
 0x1df   : > { %v2733_v35 = vpop.eup %2732  ;;  %2539 = vmatprep.mubr.f32.mxu0 %v2731_v33 }
 0x1e0   : > { %2742 = vtanh.f32 %v987_v34  ;;  %v2473_v36 = vpop.f32.mrb[26].mxu1  ;;  %2540 = vmatmul.mubr.f32.gmra.mrb[18].mxu0 %v2733_v35 }
 0x1e1   : > { %2744 = vtanh.f32 %v992_v31  ;;  %v1002_v37 = vadd.f32 %v2473_v36, %v3205_v4  ;;  %v996_v38 = vpop.f32.mrb[27].mxu1 }
 0x1e2   : > { %v2735_v39 = vpop.eup %2734  ;;  %v997_v40 = vadd.f32 %v3205_v4, %v996_v38 }
 0x1e3   : > { %v2737_v41 = vpop.eup %2736  ;;  %2542 = vmatprep.mubr.f32.mxu0 %v2735_v39 }
 0x1e4   : > { %2746 = vtanh.f32 %v997_v40  ;;  %v2476_v42 = vpop.f32.mrb[28].mxu1  ;;  %2543 = vmatmul.mubr.f32.gmra.mrb[20].mxu0 %v2737_v41 }
 0x1e5   : > { %2748 = vtanh.f32 %v1002_v37  ;;  %v1012_v43 = vadd.f32 %v2476_v42, %v3205_v4  ;;  %v1006_v10 = vpop.f32.mrb[29].mxu1 }
 0x1e6   : > { %v2739_v44 = vpop.eup %2738  ;;  %v1007_v45 = vadd.f32 %v3205_v4, %v1006_v10 }
 0x1e7   : > { %v2741_v46 = vpop.eup %2740  ;;  %2545 = vmatprep.mubr.f32.mxu0 %v2739_v44 }
 0x1e8   : > { %2750 = vtanh.f32 %v1007_v45  ;;  %v2479_v47 = vpop.f32.mrb[30].mxu1  ;;  %2546 = vmatmul.mubr.f32.gmra.mrb[22].mxu0 %v2741_v46 }
 0x1e9   : > { %2752 = vtanh.f32 %v1012_v43  ;;  %v1022_v48 = vadd.f32 %v2479_v47, %v3205_v4  ;;  %v1016_v49 = vpop.f32.mrb[31].mxu1  ;;  %v3249_v47 = vld [vmem:[%s3140_s14 + $0xe0] sm:$0xff] }
 0x1ea   : > { %v2743_v50 = vpop.eup %2742  ;;  %v1017_v51 = vadd.f32 %v3205_v4, %v1016_v49 }
 0x1eb   : > { %v2745_v54 = vpop.eup %2744  ;;  %2548 = vmatprep.mubr.f32.mxu0 %v2743_v50 }
 0x1ec   : > { %2754 = vtanh.f32 %v1017_v51  ;;  %v2482_v55 = vpop.f32.mrb[32].mxu1  ;;  %2549 = vmatmul.mubr.f32.gmra.mrb[24].mxu0 %v2745_v54  ;;  %v3256_v51 = vld [vmem:[%s3140_s14 + $0xf8] sm:$0xff] }
 0x1ed   : > { %2756 = vtanh.f32 %v1022_v48  ;;  %v1032_v56 = vadd.f32 %v2482_v55, %v3205_v4  ;;  %v1026_v57 = vpop.f32.mrb[33].mxu1  ;;  %v1549_v48 = vmul.f32 %v3249_v47, %v3249_v47  ;;  %v1552_v54 = vmul.f32 %v3256_v51, %v3256_v51  ;;  %v3261_v55 = vld [vmem:[%s3140_s14 + $0xf0] sm:$0xff] }
 0x1ee   : > { %v2747_v58 = vpop.eup %2746  ;;  %v1027_v59 = vadd.f32 %v3205_v4, %v1026_v57 }
 0x1ef   : > { %v2749_v60 = vpop.eup %2748  ;;  %2551 = vmatprep.mubr.f32.mxu0 %v2747_v58  ;;  %v1638_v50 = vsel %vm1553_vm1, %v1549_v48, 0.0  ;;  %v1647_v57 = vsel %vm1553_vm1, %v1552_v54, 0.0 }
 0x1f0   : > { %2758 = vtanh.f32 %v1027_v59  ;;  %v2485_v61 = vpop.f32.mrb[34].mxu1  ;;  %2552 = vmatmul.mubr.f32.gmra.mrb[26].mxu0 %v2749_v60  ;;  %1639 = vadd.xlane.f32.xlu0 %v1638_v50  ;;  %v3270_v59 = vld [vmem:[%s4004_s10] ss:$0 sm:$0xff]  ;;  %v1426_v50 = vld [vmem:[%s3276_s24 + $0x48] sm:$0xff] }
 0x1f1   : > { %2760 = vtanh.f32 %v1032_v56  ;;  %v1042_v62 = vadd.f32 %v2485_v61, %v3205_v4  ;;  %v1036_v63 = vpop.f32.mrb[35].mxu1  ;;  %v1551_v56 = vmul.f32 %v3261_v55, %v3261_v55  ;;  %v3281_v60 = vld [vmem:[%s4003_s9] ss:$0 sm:$0xff]  ;;  %v1457_v61 = vmul.f32 %v3270_v59, %v3146_v53 }
 0x1f2   : > { %v2751_v0 = vpop.eup %2750  ;;  %v1037_v1 = vadd.f32 %v3205_v4, %v1036_v63  ;;  %v1418_v63 = vld [vmem:[%s3276_s24 + $0x8] sm:$0xff]  ;;  %v1459_v53 = vmul.f32 %v3270_v59, %v3143_v52 }
 0x1f3   : > { %v2753_v2 = vpop.eup %2752  ;;  %2554 = vmatprep.mubr.f32.mxu0 %v2751_v0  ;;  %v1644_v58 = vsel %vm1553_vm1, %v1551_v56, 0.0 }
 0x1f4   : > { %2762 = vtanh.f32 %v1037_v1  ;;  %v2488_v3 = vpop.f32.mrb[36].mxu1  ;;  %2555 = vmatmul.mubr.f32.gmra.mrb[28].mxu0 %v2753_v2  ;;  %1645 = vadd.xlane.f32.xlu0 %v1644_v58  ;;  %v1417_v2 = vld [vmem:[%s3276_s24] sm:$0xff] }
 0x1f5   : > { %2764 = vtanh.f32 %v1042_v62  ;;  %v1052_v5 = vadd.f32 %v2488_v3, %v3205_v4  ;;  %v1046_v6 = vpop.f32.mrb[37].mxu1  ;;  %v1425_v58 = vld [vmem:[%s3276_s24 + $0x40] sm:$0xff] }
 0x1f6   : > { %v2755_v7 = vpop.eup %2754  ;;  %v1047_v8 = vadd.f32 %v3205_v4, %v1046_v6 }
 0x1f7   : > { %v2757_v9 = vpop.eup %2756  ;;  %2557 = vmatprep.mubr.f32.mxu0 %v2755_v7 }
 0x1f8   : > { %2766 = vtanh.f32 %v1047_v8  ;;  %v2491_v11 = vpop.f32.mrb[38].mxu1  ;;  %2558 = vmatmul.mubr.f32.gmra.mrb[30].mxu0 %v2757_v9 }
 0x1f9   : > { %2768 = vtanh.f32 %v1052_v5  ;;  %v1062_v12 = vadd.f32 %v2491_v11, %v3205_v4  ;;  %v1056_v13 = vpop.f32.mrb[39].mxu1  ;;  %v3294_v5 = vld [vmem:[%s4005_s11] ss:$0 sm:$0xff]  ;;  %v1420_v11 = vld [vmem:[%s3276_s24 + $0x18] sm:$0xff] }
 0x1fa   : > { %v2759_v14 = vpop.eup %2758  ;;  %v1057_v15 = vadd.f32 %v3205_v4, %v1056_v13 }
 0x1fb   : > { %v2761_v16 = vpop.eup %2760  ;;  %2560 = vmatprep.mubr.f32.mxu0 %v2759_v14  ;;  %v1419_v14 = vld [vmem:[%s3276_s24 + $0x10] sm:$0xff] }
 0x1fc   : > { %2770 = vtanh.f32 %v1057_v15  ;;  %v2494_v17 = vpop.f32.mrb[40].mxu1  ;;  %2561 = vmatmul.mubr.f32.gmra.mrb[32].mxu0 %v2761_v16 }
 0x1fd   : > { %2772 = vtanh.f32 %v1062_v12  ;;  %v1072_v18 = vadd.f32 %v2494_v17, %v3205_v4  ;;  %v1066_v19 = vpop.f32.mrb[41].mxu1 }
 0x1fe   : > { %v2763_v20 = vpop.eup %2762  ;;  %v1067_v21 = vadd.f32 %v3205_v4, %v1066_v19 }
 0x1ff   : > { %v2765_v22 = vpop.eup %2764  ;;  %2563 = vmatprep.mubr.f32.mxu0 %v2763_v20 }
 0x200   : > { %2774 = vtanh.f32 %v1067_v21  ;;  %v2497_v23 = vpop.f32.mrb[42].mxu1  ;;  %2564 = vmatmul.mubr.f32.gmra.mrb[34].mxu0 %v2765_v22  ;;  %v1422_v22 = vld [vmem:[%s3276_s24 + $0x28] sm:$0xff] }
 0x201   : > { %2776 = vtanh.f32 %v1072_v18  ;;  %v1082_v24 = vadd.f32 %v2497_v23, %v3205_v4  ;;  %v1076_v25 = vpop.f32.mrb[43].mxu1 }
 0x202   : > { %v2767_v26 = vpop.eup %2766  ;;  %v1077_v27 = vadd.f32 %v3205_v4, %v1076_v25 }
 0x203   : > { %v2769_v28 = vpop.eup %2768  ;;  %2566 = vmatprep.mubr.f32.mxu0 %v2767_v26  ;;  %v1421_v26 = vld [vmem:[%s3276_s24 + $0x20] sm:$0xff] }
 0x204   : > { %2778 = vtanh.f32 %v1077_v27  ;;  %v2500_v29 = vpop.f32.mrb[44].mxu1  ;;  %2567 = vmatmul.mubr.f32.gmra.mrb[36].mxu0 %v2769_v28 }
 0x205   : > { %2780 = vtanh.f32 %v1082_v24  ;;  %v1092_v30 = vadd.f32 %v2500_v29, %v3205_v4  ;;  %v1086_v31 = vpop.f32.mrb[45].mxu1 }
 0x206   : > { %v2771_v32 = vpop.eup %2770  ;;  %v1087_v33 = vadd.f32 %v3205_v4, %v1086_v31 }
 0x207   : > { %v2773_v34 = vpop.eup %2772  ;;  %2569 = vmatprep.mubr.f32.mxu0 %v2771_v32 }
 0x208   : > { %2782 = vtanh.f32 %v1087_v33  ;;  %v2503_v35 = vpop.f32.mrb[46].mxu1  ;;  %2570 = vmatmul.mubr.f32.gmra.mrb[38].mxu0 %v2773_v34 }
 0x209   : > { %2784 = vtanh.f32 %v1092_v30  ;;  %v1102_v36 = vadd.f32 %v2503_v35, %v3205_v4  ;;  %v1096_v37 = vpop.f32.mrb[47].mxu1 }
 0x20a   : > { %v2775_v38 = vpop.eup %2774  ;;  %v1097_v39 = vadd.f32 %v3205_v4, %v1096_v37  ;;  %v3244_v4 = vld [vmem:[%s3140_s14 + $0xe8] sm:$0xff] }
 0x20b   : > { %v2777_v40 = vpop.eup %2776  ;;  %2572 = vmatprep.mubr.f32.mxu0 %v2775_v38  ;;  %v1550_v46 = vmul.f32 %v3244_v4, %v3244_v4 }
 0x20c   : > { %2786 = vtanh.f32 %v1097_v39  ;;  %2573 = vmatmul.mubr.f32.gmra.mrb[40].mxu0 %v2777_v40  ;;  %v1423_v40 = vld [vmem:[%s3276_s24 + $0x30] sm:$0xff] }
 0x20d   : > { %2788 = vtanh.f32 %v1102_v36  ;;  %v1641_v49 = vsel %vm1553_vm1, %v1550_v46, 0.0  ;;  %v1424_v36 = vld [vmem:[%s3276_s24 + $0x38] sm:$0xff] }
 0x20e   : > { %v2779_v41 = vpop.eup %2778  ;;  %1642 = vadd.xlane.f32.xlu1 %v1641_v49 }
 0x20f   : > { %v2781_v42 = vpop.eup %2780  ;;  %2575 = vmatprep.mubr.f32.mxu0 %v2779_v41 }
 0x210   : > { %2576 = vmatmul.mubr.f32.gmra.mrb[42].mxu0 %v2781_v42 }
 0x212   : > { %v2783_v43 = vpop.eup %2782  ;;  %1648 = vadd.xlane.f32.xlu1 %v1647_v57 }
 0x213   : > { %v2785_v10 = vpop.eup %2784  ;;  %2578 = vmatprep.mubr.f32.mxu0 %v2783_v43 }
 0x214   : > { %2579 = vmatmul.mubr.f32.gmra.mrb[44].mxu0 %v2785_v10 }
 0x216   : > { %v2787_v44 = vpop.eup %2786 }
 0x217   : > { %v2789_v45 = vpop.eup %2788  ;;  %2581 = vmatprep.mubr.f32.mxu0 %v2787_v44 }
 0x218   : > { %2582 = vmatmul.mubr.f32.gmra.mrb[46].mxu0 %v2789_v45 }
 0x2af   : > { %v2538_v62 = vpop.f32.mrb[16].mxu0 }
 0x2b0   : > { %v3287_v0 = vadd.f32 %v2538_v62, %v3281_v60  ;;  %v1226_v1 = vpop.f32.mrb[17].mxu0 }
 0x2b1   : > { %v1227_v3 = vadd.f32 %v3281_v60, %v1226_v1 }
 0x2b2   : > { %v1716_v6 = vsub.f32 %v1418_v63, %v3287_v0 }
 0x2b3   : > { %v3299_v7 = vadd.f32 %v1457_v61, %v1227_v3  ;;  %v1715_v8 = vsub.f32 %v1417_v2, %v1227_v3  ;;  %v2541_v9 = vpop.f32.mrb[18].mxu0 }
 0x2b4   : > { %v3303_v12 = vadd.f32 %v2541_v9, %v3281_v60  ;;  %v1236_v13 = vpop.f32.mrb[19].mxu0  ;;  %v1755_v15 = vmul.f32 %v3294_v5, %v1716_v6  ;;  %v1428_v9 = vld [vmem:[%s3276_s24 + $0x58] sm:$0xff] }
 0x2b5   : > { %v1237_v16 = vadd.f32 %v3281_v60, %v1236_v13  ;;  %v1754_v17 = vmul.f32 %v3294_v5, %v1715_v8 }
 0x2b6   : > { %v1718_v52 = vsub.f32 %v1420_v11, %v3303_v12  ;;  %v1787_v18 = vmul.f32 %v1755_v15, %v1755_v15  ;;  %v1427_v15 = vld [vmem:[%s3276_s24 + $0x50] sm:$0xff] }
 0x2b7   : > { %v3310_v19 = vadd.f32 %v1459_v53, %v1237_v16  ;;  %v1717_v20 = vsub.f32 %v1419_v14, %v1237_v16  ;;  %v2544_v21 = vpop.f32.mrb[20].mxu0  ;;  %v1786_v23 = vmul.f32 %v1754_v17, %v1754_v17 }
 0x2b8   : > { %v3314_v24 = vadd.f32 %v2544_v21, %v3281_v60  ;;  %v1246_v25 = vpop.f32.mrb[21].mxu0  ;;  %v1821_v27 = vsel %vm1553_vm1, %v1787_v18, 0.0  ;;  %v1757_v28 = vmul.f32 %v3294_v5, %v1718_v52 }
 0x2b9   : > { %v3320_v29 = vadd.f32 %v3281_v60, %v1246_v25  ;;  %1822 = vadd.xlane.f32.xlu1 %v1821_v27  ;;  %v1818_v30 = vsel %vm1553_vm1, %v1786_v23, 0.0  ;;  %v1756_v31 = vmul.f32 %v3294_v5, %v1717_v20 }
 0x2ba   : > { %v1720_v32 = vsub.f32 %v1422_v22, %v3314_v24  ;;  %1819 = vadd.xlane.f32.xlu0 %v1818_v30  ;;  %v1789_v33 = vmul.f32 %v1757_v28, %v1757_v28 }
 0x2bb   : > { %v1719_v34 = vsub.f32 %v1421_v26, %v3320_v29  ;;  %v2547_v35 = vpop.f32.mrb[22].mxu0  ;;  %v1788_v37 = vmul.f32 %v1756_v31, %v1756_v31  ;;  %v1430_v26 = vld [vmem:[%s3276_s24 + $0x68] sm:$0xff]  ;;  %v1429_v31 = vld [vmem:[%s3276_s24 + $0x60] sm:$0xff] }
 0x2bc   : > { %v3328_v38 = vadd.f32 %v2547_v35, %v3281_v60  ;;  %v1256_v39 = vpop.f32.mrb[23].mxu0  ;;  %v1827_v41 = vsel %vm1553_vm1, %v1789_v33, 0.0  ;;  %v1759_v42 = vmul.f32 %v3294_v5, %v1720_v32 }
 0x2bd   : > { %v3334_v43 = vadd.f32 %v3281_v60, %v1256_v39  ;;  %1828 = vadd.xlane.f32.xlu1 %v1827_v41  ;;  %v1824_v10 = vsel %vm1553_vm1, %v1788_v37, 0.0  ;;  %v1758_v44 = vmul.f32 %v3294_v5, %v1719_v34 }
 0x2be   : > { %v1722_v45 = vsub.f32 %v1424_v36, %v3328_v38  ;;  %1825 = vadd.xlane.f32.xlu0 %v1824_v10  ;;  %v1791_v46 = vmul.f32 %v1759_v42, %v1759_v42  ;;  %v1432_v42 = vld [vmem:[%s3276_s24 + $0x78] sm:$0xff] }
 0x2bf   : > { %v1721_v48 = vsub.f32 %v1423_v40, %v3334_v43  ;;  %v2550_v49 = vpop.f32.mrb[24].mxu0  ;;  %v1790_v54 = vmul.f32 %v1758_v44, %v1758_v44 }
 0x2c0   : > { %v3342_v56 = vadd.f32 %v2550_v49, %v3281_v60  ;;  %v1266_v57 = vpop.f32.mrb[25].mxu0  ;;  %v1833_v61 = vsel %vm1553_vm1, %v1791_v46, 0.0  ;;  %v1761_v62 = vmul.f32 %v3294_v5, %v1722_v45  ;;  %v1431_v46 = vld [vmem:[%s3276_s24 + $0x70] sm:$0xff] }
 0x2c1   : > { %v3348_v63 = vadd.f32 %v3281_v60, %v1266_v57  ;;  %1834 = vadd.xlane.f32.xlu1 %v1833_v61  ;;  %v1830_v1 = vsel %vm1553_vm1, %v1790_v54, 0.0  ;;  %v1760_v2 = vmul.f32 %v3294_v5, %v1721_v48 }
 0x2c2   : > { %v1724_v3 = vsub.f32 %v1426_v50, %v3342_v56  ;;  %1831 = vadd.xlane.f32.xlu0 %v1830_v1  ;;  %v1793_v6 = vmul.f32 %v1761_v62, %v1761_v62 }
 0x2c3   : > { %v1723_v53 = vsub.f32 %v1425_v58, %v3348_v63  ;;  %v2553_v8 = vpop.f32.mrb[26].mxu0  ;;  %v1792_v11 = vmul.f32 %v1760_v2, %v1760_v2  ;;  %v1434_v2 = vld [vmem:[%s3276_s24 + $0x88] sm:$0xff] }
 0x2c4   : > { %v3356_v13 = vadd.f32 %v2553_v8, %v3281_v60  ;;  %v1276_v14 = vpop.f32.mrb[27].mxu0  ;;  %v1839_v16 = vsel %vm1553_vm1, %v1793_v6, 0.0  ;;  %v1763_v17 = vmul.f32 %v3294_v5, %v1724_v3  ;;  %v1433_v8 = vld [vmem:[%s3276_s24 + $0x80] sm:$0xff] }
 0x2c5   : > { %v3362_v52 = vadd.f32 %v3281_v60, %v1276_v14  ;;  %1840 = vadd.xlane.f32.xlu1 %v1839_v16  ;;  %v1836_v18 = vsel %vm1553_vm1, %v1792_v11, 0.0  ;;  %v1762_v20 = vmul.f32 %v3294_v5, %v1723_v53 }
 0x2c6   : > { %v1726_v21 = vsub.f32 %v1428_v9, %v3356_v13  ;;  %1837 = vadd.xlane.f32.xlu0 %v1836_v18  ;;  %v1795_v22 = vmul.f32 %v1763_v17, %v1763_v17 }
 0x2c7   : > { %v1725_v23 = vsub.f32 %v1427_v15, %v3362_v52  ;;  %v2556_v25 = vpop.f32.mrb[28].mxu0  ;;  %v1794_v27 = vmul.f32 %v1762_v20, %v1762_v20 }
 0x2c8   : > { %v3370_v28 = vadd.f32 %v2556_v25, %v3281_v60  ;;  %v1286_v30 = vpop.f32.mrb[29].mxu0  ;;  %v1845_v32 = vsel %vm1553_vm1, %v1795_v22, 0.0  ;;  %v1765_v33 = vmul.f32 %v3294_v5, %v1726_v21  ;;  %v1436_v22 = vld [vmem:[%s3276_s24 + $0x98] sm:$0xff] }
 0x2c9   : > { %v3376_v34 = vadd.f32 %v3281_v60, %v1286_v30  ;;  %1846 = vadd.xlane.f32.xlu1 %v1845_v32  ;;  %v1842_v35 = vsel %vm1553_vm1, %v1794_v27, 0.0  ;;  %v1764_v36 = vmul.f32 %v3294_v5, %v1725_v23  ;;  %v1435_v27 = vld [vmem:[%s3276_s24 + $0x90] sm:$0xff] }
 0x2ca   : > { %v1728_v37 = vsub.f32 %v1430_v26, %v3370_v28  ;;  %1843 = vadd.xlane.f32.xlu0 %v1842_v35  ;;  %v1797_v39 = vmul.f32 %v1765_v33, %v1765_v33 }
 0x2cb   : > { %v1727_v40 = vsub.f32 %v1429_v31, %v3376_v34  ;;  %v2559_v41 = vpop.f32.mrb[30].mxu0  ;;  %v1796_v10 = vmul.f32 %v1764_v36, %v1764_v36 }
 0x2cc   : > { %v3384_v44 = vadd.f32 %v2559_v41, %v3281_v60  ;;  %v1296_v45 = vpop.f32.mrb[31].mxu0  ;;  %v1851_v48 = vsel %vm1553_vm1, %v1797_v39, 0.0  ;;  %v1767_v49 = vmul.f32 %v3294_v5, %v1728_v37  ;;  %v1438_v41 = vld [vmem:[%s3276_s24 + $0xa8] sm:$0xff] }
 0x2cd   : > { %v3390_v50 = vadd.f32 %v3281_v60, %v1296_v45  ;;  %1852 = vadd.xlane.f32.xlu1 %v1851_v48  ;;  %v1848_v54 = vsel %vm1553_vm1, %v1796_v10, 0.0  ;;  %v1766_v57 = vmul.f32 %v3294_v5, %v1727_v40 }
 0x2ce   : > { %v1730_v58 = vsub.f32 %v1432_v42, %v3384_v44  ;;  %1849 = vadd.xlane.f32.xlu0 %v1848_v54  ;;  %v1799_v61 = vmul.f32 %v1767_v49, %v1767_v49 }
 0x2cf   : > { %v1729_v62 = vsub.f32 %v1431_v46, %v3390_v50  ;;  %v2562_v1 = vpop.f32.mrb[32].mxu0  ;;  %v1798_v3 = vmul.f32 %v1766_v57, %v1766_v57  ;;  %v1437_v46 = vld [vmem:[%s3276_s24 + $0xa0] sm:$0xff] }
 0x2d0   : > { %v3398_v6 = vadd.f32 %v2562_v1, %v3281_v60  ;;  %v1306_v53 = vpop.f32.mrb[33].mxu0  ;;  %v1857_v9 = vsel %vm1553_vm1, %v1799_v61, 0.0  ;;  %v1769_v11 = vmul.f32 %v3294_v5, %v1730_v58 }
 0x2d1   : > { %v3404_v14 = vadd.f32 %v3281_v60, %v1306_v53  ;;  %1858 = vadd.xlane.f32.xlu1 %v1857_v9  ;;  %v1854_v15 = vsel %vm1553_vm1, %v1798_v3, 0.0  ;;  %v1768_v16 = vmul.f32 %v3294_v5, %v1729_v62  ;;  %v1440_v3 = vld [vmem:[%s3276_s24 + $0xb8] sm:$0xff] }
 0x2d2   : > { %v1732_v17 = vsub.f32 %v1434_v2, %v3398_v6  ;;  %1855 = vadd.xlane.f32.xlu0 %v1854_v15  ;;  %v1801_v18 = vmul.f32 %v1769_v11, %v1769_v11  ;;  %v1439_v11 = vld [vmem:[%s3276_s24 + $0xb0] sm:$0xff] }
 0x2d3   : > { %v1731_v20 = vsub.f32 %v1433_v8, %v3404_v14  ;;  %v2565_v21 = vpop.f32.mrb[34].mxu0  ;;  %v1800_v23 = vmul.f32 %v1768_v16, %v1768_v16 }
 0x2d4   : > { %v3412_v25 = vadd.f32 %v2565_v21, %v3281_v60  ;;  %v1316_v26 = vpop.f32.mrb[35].mxu0  ;;  %v1863_v30 = vsel %vm1553_vm1, %v1801_v18, 0.0  ;;  %v1771_v31 = vmul.f32 %v3294_v5, %v1732_v17 }
 0x2d5   : > { %v3418_v32 = vadd.f32 %v3281_v60, %v1316_v26  ;;  %1864 = vadd.xlane.f32.xlu1 %v1863_v30  ;;  %v1860_v33 = vsel %vm1553_vm1, %v1800_v23, 0.0  ;;  %v1770_v35 = vmul.f32 %v3294_v5, %v1731_v20 }
 0x2d6   : > { %v1734_v36 = vsub.f32 %v1436_v22, %v3412_v25  ;;  %1861 = vadd.xlane.f32.xlu0 %v1860_v33  ;;  %v1803_v37 = vmul.f32 %v1771_v31, %v1771_v31 }
 0x2d7   : > { %v1733_v39 = vsub.f32 %v1435_v27, %v3418_v32  ;;  %v2568_v40 = vpop.f32.mrb[36].mxu0  ;;  %v1802_v42 = vmul.f32 %v1770_v35, %v1770_v35  ;;  %v1442_v27 = vld [vmem:[%s3276_s24 + $0xc8] sm:$0xff]  ;;  %v1441_v35 = vld [vmem:[%s3276_s24 + $0xc0] sm:$0xff] }
 0x2d8   : > { %v3426_v10 = vadd.f32 %v2568_v40, %v3281_v60  ;;  %v1326_v45 = vpop.f32.mrb[37].mxu0  ;;  %v1869_v48 = vsel %vm1553_vm1, %v1803_v37, 0.0  ;;  %v1773_v49 = vmul.f32 %v3294_v5, %v1734_v36 }
 0x2d9   : > { %v3432_v54 = vadd.f32 %v3281_v60, %v1326_v45  ;;  %1870 = vadd.xlane.f32.xlu1 %v1869_v48  ;;  %v1866_v57 = vsel %vm1553_vm1, %v1802_v42, 0.0  ;;  %v1772_v58 = vmul.f32 %v3294_v5, %v1733_v39 }
 0x2da   : > { %v1736_v61 = vsub.f32 %v1438_v41, %v3426_v10  ;;  %1867 = vadd.xlane.f32.xlu0 %v1866_v57  ;;  %v1805_v62 = vmul.f32 %v1773_v49, %v1773_v49  ;;  %v1444_v49 = vld [vmem:[%s3276_s24 + $0xd8] sm:$0xff] }
 0x2db   : > { %4014 = vst [vmem:[#allocation3_spill] sm:$0xff] %v3432_v54  ;;  %v1735_v1 = vsub.f32 %v1437_v46, %v3432_v54  ;;  %v2571_v2 = vpop.f32.mrb[38].mxu0  ;;  %v1804_v53 = vmul.f32 %v1772_v58, %v1772_v58 }
 0x2dc   : > { %v3440_v8 = vadd.f32 %v2571_v2, %v3281_v60  ;;  %v1336_v9 = vpop.f32.mrb[39].mxu0  ;;  %v1875_v15 = vsel %vm1553_vm1, %v1805_v62, 0.0  ;;  %v1775_v16 = vmul.f32 %v3294_v5, %v1736_v61  ;;  %v1443_v62 = vld [vmem:[%s3276_s24 + $0xd0] sm:$0xff] }
 0x2dd   : > { %v3446_v17 = vadd.f32 %v3281_v60, %v1336_v9  ;;  %1876 = vadd.xlane.f32.xlu1 %v1875_v15  ;;  %v1872_v18 = vsel %vm1553_vm1, %v1804_v53, 0.0  ;;  %v1774_v20 = vmul.f32 %v3294_v5, %v1735_v1  ;;  %v1486_v15 = vmul.f32 %v3270_v59, %v3244_v4 }
 0x2de   : > { %4015 = vst [vmem:[#allocation4_spill] sm:$0xff] %v3440_v8  ;;  %v1738_v21 = vsub.f32 %v1440_v3, %v3440_v8  ;;  %1873 = vadd.xlane.f32.xlu0 %v1872_v18  ;;  %v1807_v22 = vmul.f32 %v1775_v16, %v1775_v16  ;;  %v3481_v18 = vpop.xlane.xlu1 %1561 }
 0x2df   : > { %4016 = vst [vmem:[#allocation5_spill] sm:$0xff] %v3446_v17  ;;  %v1737_v23 = vsub.f32 %v1439_v11, %v3446_v17  ;;  %v2574_v26 = vpop.f32.mrb[40].mxu0  ;;  %v1806_v30 = vmul.f32 %v1774_v20, %v1774_v20  ;;  %v2790_v17 = vld [vmem:[%s3140_s14 + $0x8] sm:$0xff] }
 0x2e0   : > { %v3454_v31 = vadd.f32 %v2574_v26, %v3281_v60  ;;  %v1346_v33 = vpop.f32.mrb[41].mxu0  ;;  %v1881_v36 = vsel %vm1553_vm1, %v1807_v22, 0.0  ;;  %v1777_v37 = vmul.f32 %v3294_v5, %v1738_v21  ;;  %v1446_v22 = vld [vmem:[%s3276_s24 + $0xe8] sm:$0xff] }
 0x2e1   : > { %v3460_v39 = vadd.f32 %v3281_v60, %v1346_v33  ;;  %1882 = vadd.xlane.f32.xlu1 %v1881_v36  ;;  %v1878_v40 = vsel %vm1553_vm1, %v1806_v30, 0.0  ;;  %v1776_v41 = vmul.f32 %v3294_v5, %v1737_v23  ;;  %v1485_v23 = vmul.f32 %v3270_v59, %v3249_v47 }
 0x2e2   : > { %4017 = vst [vmem:[#allocation6_spill] sm:$0xff] %v3454_v31  ;;  %v1740_v42 = vsub.f32 %v1442_v27, %v3454_v31  ;;  %1879 = vadd.xlane.f32.xlu0 %v1878_v40  ;;  %v1809_v45 = vmul.f32 %v1777_v37, %v1777_v37  ;;  %v3487_v27 = vpop.xlane.xlu0 %1555 }
 0x2e3   : > { %4018 = vst [vmem:[#allocation7_spill] sm:$0xff] %v3460_v39  ;;  %v1739_v46 = vsub.f32 %v1441_v35, %v3460_v39  ;;  %v2577_v48 = vpop.f32.mrb[42].mxu0  ;;  %v1808_v57 = vmul.f32 %v1776_v41, %v1776_v41  ;;  %v1445_v35 = vld [vmem:[%s3276_s24 + $0xe0] sm:$0xff]  ;;  %v1652_v39 = vmul.f32 -0.5, %v3481_v18  ;;  %v2791_v18 = vld [vmem:[%s3140_s14 + $0x18] sm:$0xff] }
 0x2e4   : > { %v3468_v58 = vadd.f32 %v2577_v48, %v3281_v60  ;;  %v1356_v61 = vpop.f32.mrb[43].mxu0  ;;  %v1887_v1 = vsel %vm1553_vm1, %v1809_v45, 0.0  ;;  %v1779_v2 = vmul.f32 %v3294_v5, %v1740_v42  ;;  %v1488_v45 = vmul.f32 %v3270_v59, %v3256_v51 }
 0x2e5   : > { %v3474_v3 = vadd.f32 %v3281_v60, %v1356_v61  ;;  %1888 = vadd.xlane.f32.xlu1 %v1887_v1  ;;  %v1884_v53 = vsel %vm1553_vm1, %v1808_v57, 0.0  ;;  %v1778_v9 = vmul.f32 %v3294_v5, %v1739_v46  ;;  %v1448_v61 = vld [vmem:[%s3276_s24 + $0xf8] sm:$0xff] }
 0x2e6   : > { %4019 = vst [vmem:[#allocation8_spill] sm:$0xff] %v3468_v58  ;;  %v1742_v11 = vsub.f32 %v1444_v49, %v3468_v58  ;;  %1885 = vadd.xlane.f32.xlu0 %v1884_v53  ;;  %v1811_v16 = vmul.f32 %v1779_v2, %v1779_v2 }
 0x2e7   : > { %4020 = vst [vmem:[#allocation9_spill] sm:$0xff] %v3474_v3  ;;  %v1741_v20 = vsub.f32 %v1443_v62, %v3474_v3  ;;  %v2580_v21 = vpop.f32.mrb[44].mxu0  ;;  %v1810_v26 = vmul.f32 %v1778_v9, %v1778_v9  ;;  %v1487_v62 = vmul.f32 %v3270_v59, %v3261_v55  ;;  %v1447_v9 = vld [vmem:[%s3276_s24 + $0xf0] sm:$0xff]  ;;  %v3575_v3 = vstv %s1449_s27 }
 0x2e8   : > { %v1372_v30 = vadd.f32 %v2580_v21, %v3281_v60  ;;  %v1366_v33 = vpop.f32.mrb[45].mxu0  ;;  %v1893_v4 = vsel %vm1553_vm1, %v1811_v16, 0.0  ;;  %v1781_v36 = vmul.f32 %v3294_v5, %v1742_v11  ;;  %v1565_v16 = vpop.xlane.xlu1 %1564 }
 0x2e9   : > { %v1367_v37 = vadd.f32 %v3281_v60, %v1366_v33  ;;  %1894 = vadd.xlane.f32.xlu1 %v1893_v4  ;;  %v1890_v40 = vsel %vm1553_vm1, %v1810_v26, 0.0  ;;  %v1780_v47 = vmul.f32 %v3294_v5, %v1741_v20  ;;  %v1653_v31 = vmul.f32 -0.5, %v1565_v16 }
 0x2ea   : > { %v3496_v41 = vadd.f32 %v1486_v15, %v1372_v30  ;;  %v1744_v42 = vsub.f32 %v1446_v22, %v1372_v30  ;;  %1891 = vadd.xlane.f32.xlu0 %v1890_v40  ;;  %v1813_v46 = vmul.f32 %v1781_v36, %v1781_v36  ;;  %v1559_v22 = vpop.xlane.xlu0 %1558 }
 0x2eb   : > { %v3500_v48 = vadd.f32 %v1485_v23, %v1367_v37  ;;  %v1743_v49 = vsub.f32 %v1445_v35, %v1367_v37  ;;  %v2583_v57 = vpop.f32.mrb[46].mxu0  ;;  %v1812_v1 = vmul.f32 %v1780_v47, %v1780_v47 }
 0x2ec   : > { %4021 = vst [vmem:[#allocation10_spill] sm:$0xff] %v3496_v41  ;;  %v1382_v2 = vadd.f32 %v2583_v57, %v3281_v60  ;;  %v1376_v53 = vpop.f32.mrb[47].mxu0  ;;  %v1899_v11 = vsel %vm1553_vm1, %v1813_v46, 0.0  ;;  %v1783_v15 = vmul.f32 %v3294_v5, %v1744_v42  ;;  %v1571_v47 = vpop.xlane.xlu1 %1570  ;;  %v1650_v41 = vmul.f32 -0.5, %v3487_v27 }
 0x2ed   : > { %4022 = vst [vmem:[#allocation11_spill] sm:$0xff] %v3500_v48  ;;  %v1377_v51 = vadd.f32 %v3281_v60, %v1376_v53  ;;  %1900 = vadd.xlane.f32.xlu1 %v1899_v11  ;;  %v1896_v20 = vsel %vm1553_vm1, %v1812_v1, 0.0  ;;  %v1782_v21 = vmul.f32 %v3294_v5, %v1743_v49  ;;  %v1651_v48 = vmul.f32 -0.5, %v1559_v22 }
 0x2ee   : > { %v3512_v23 = vadd.f32 %v1488_v45, %v1382_v2  ;;  %v1746_v55 = vsub.f32 %v1448_v61, %v1382_v2  ;;  %1897 = vadd.xlane.f32.xlu0 %v1896_v20  ;;  %v1815_v26 = vmul.f32 %v1783_v15, %v1783_v15  ;;  %v1568_v45 = vpop.xlane.xlu0 %1567 }
 0x2ef   : > { %v3514_v30 = vadd.f32 %v1487_v62, %v1377_v51  ;;  %v1745_v33 = vsub.f32 %v1447_v9, %v1377_v51  ;;  %v1814_v35 = vmul.f32 %v1782_v21, %v1782_v21 }
 0x2f0   : > { %4023 = vst [vmem:[#allocation12_spill] sm:$0xff] %v3512_v23  ;;  %v1905_v4 = vsel %vm1553_vm1, %v1815_v26, 0.0  ;;  %v1785_v36 = vmul.f32 %v3294_v5, %v1746_v55  ;;  %v3522_v57 = vpop.xlane.xlu1 %1576 }
 0x2f1   : > { %4024 = vst [vmem:[#allocation13_spill] sm:$0xff] %v3514_v30  ;;  %1906 = vadd.xlane.f32.xlu1 %v1905_v4  ;;  %v1902_v60 = vsel %vm1553_vm1, %v1814_v35, 0.0  ;;  %v1784_v37 = vmul.f32 %v3294_v5, %v1745_v33 }
 0x2f2   : > { %1903 = vadd.xlane.f32.xlu0 %v1902_v60  ;;  %v1817_v40 = vmul.f32 %v1785_v36, %v1785_v36  ;;  %v3524_v61 = vpop.xlane.xlu0 %1573 }
 0x2f3   : > { %v1816_v42 = vmul.f32 %v1784_v37, %v1784_v37 }
 0x2f4   : > { %v1911_v46 = vsel %vm1553_vm1, %v1817_v40, 0.0  ;;  %v3526_v62 = vpop.xlane.xlu1 %1582 }
 0x2f5   : > { %1912 = vadd.xlane.f32.xlu1 %v1911_v46  ;;  %v1908_v49 = vsel %vm1553_vm1, %v1816_v42, 0.0 }
 0x2f6   : > { %1909 = vadd.xlane.f32.xlu0 %v1908_v49  ;;  %v3528_v1 = vpop.xlane.xlu0 %1579  ;;  %v1978_v49 = vlaneseq }
 0x2f8   : > { %v3530_v5 = vpop.xlane.xlu1 %1588  ;;  %v3577_v58 = vand.u32 127, %v1978_v49  ;;  %v1654_v49 = vmul.f32 -0.5, %v1568_v45 }
 0x2fa   : > { %v3532_v2 = vpop.xlane.xlu0 %1585  ;;  %vm1980_vm2 = vcmp.eq.s32.totalorder %v3577_v58, 4  ;;  %vm2013_vm3 = vcmp.eq.s32.totalorder %v3577_v58, 5 }
 0x2fc   : > { %v3534_v53 = vpop.xlane.xlu1 %1594 }
 0x2fe   : > { %v3536_v9 = vpop.xlane.xlu0 %1591 }
 0x300   : > { %v3538_v11 = vpop.xlane.xlu1 %1600 }
 0x302   : > { %v3540_v15 = vpop.xlane.xlu0 %1597 }
 0x304   : > { %v3542_v51 = vpop.xlane.xlu1 %1606 }
 0x306   : > { %v3544_v20 = vpop.xlane.xlu0 %1603 }
 0x308   : > { %v3546_v21 = vpop.xlane.xlu1 %1612 }
 0x30a   : > { %v3548_v55 = vpop.xlane.xlu0 %1609 }
 0x30c   : > { %v3550_v26 = vpop.xlane.xlu1 %1618 }
 0x30e   : > { %v3552_v33 = vpop.xlane.xlu0 %1615 }
 0x310   : > { %v3554_v35 = vpop.xlane.xlu1 %1624 }
 0x312   : > { %v3556_v4 = vpop.xlane.xlu0 %1621 }
 0x314   : > { %v3558_v36 = vpop.xlane.xlu1 %1630 }
 0x316   : > { %v3560_v60 = vpop.xlane.xlu0 %1627 }
 0x318   : > { %v3562_v37 = vpop.xlane.xlu1 %1636 }
 0x319   : > { %4025 = vst [vmem:[#allocation14_spill] sm:$0xff] %v3562_v37 }
 0x31a   : > { %v3564_v40 = vpop.xlane.xlu0 %1633 }
 0x31b   : > { %4026 = vst [vmem:[#allocation15_spill] sm:$0xff] %v3564_v40 }
 0x31c   : > { %v3566_v42 = vpop.xlane.xlu1 %1642 }
 0x31d   : > { %4027 = vst [vmem:[#allocation16_spill] sm:$0xff] %v3566_v42 }
 0x31e   : > { %v3568_v46 = vpop.xlane.xlu0 %1639 }
 0x31f   : > { %4028 = vst [vmem:[#allocation17_spill] sm:$0xff] %v3568_v46  ;;  %v1684_v46 = vadd.f32 %v3575_v3, %v1651_v48  ;;  %v1460_v48 = vmul.f32 %v2791_v18, %v3270_v59 }
 0x320   : > { %v3570_v30 = vpop.xlane.xlu1 %1648 }
 0x321   : > { %4029 = vst [vmem:[#allocation18_spill] sm:$0xff] %v3570_v30  ;;  %v1458_v30 = vmul.f32 %v2790_v17, %v3270_v59  ;;  %v1685_v17 = vadd.f32 %v3575_v3, %v1652_v39 }
 0x322   : > { %v3572_v23 = vpop.xlane.xlu0 %1645 }
 0x323   : > { %4030 = vst [vmem:[#allocation19_spill] sm:$0xff] %v3572_v23  ;;  %v1683_v23 = vadd.f32 %v3575_v3, %v1650_v41  ;;  %v1686_v41 = vadd.f32 %v3575_v3, %v1653_v31  ;;  %v1490_v54 = vadd.f32 %v1458_v30, %v3287_v0  ;;  %v1983_v0 = vsel %vm1980_vm2, %v1685_v17, 0.0 }
 0x325   : > { %v1981_v39 = vsel %vm1980_vm2, %v1683_v23, 0.0  ;;  %v1984_v23 = vsel %vm1980_vm2, %v1686_v41, 0.0 }
 0x346   : > { %v1823_v42 = vpop.xlane.xlu1 %1822 }
 0x347   : > { %v1915_v22 = vmul.f32 -0.5, %v1823_v42  ;;  %v1820_v8 = vpop.xlane.xlu0 %1819  ;;  %v1982_v42 = vsel %vm1980_vm2, %v1684_v46, 0.0  ;;  %v2792_v46 = vld [vmem:[%s3140_s14 + $0x28] sm:$0xff] }
 0x348   : > { %v1914_v27 = vmul.f32 -0.5, %v1820_v8  ;;  %v1655_v8 = vmul.f32 -0.5, %v1571_v47 }
 0x349   : > { %v1947_v16 = vadd.f32 %v1915_v22, %v3575_v3 }
 0x34a   : > { %v1946_v40 = vadd.f32 %v1914_v27, %v3575_v3  ;;  %v1829_v37 = vpop.xlane.xlu1 %1828  ;;  %v1462_v27 = vmul.f32 %v2792_v46, %v3270_v59 }
 0x34b   : > { %v2015_v31 = vsel %vm2013_vm3, %v1947_v16, %v1982_v42  ;;  %v1917_v22 = vmul.f32 -0.5, %v1829_v37  ;;  %v1826_v18 = vpop.xlane.xlu0 %1825  ;;  %v1688_v37 = vadd.f32 %v3575_v3, %v1655_v8  ;;  %v1657_v16 = vmul.f32 -0.5, %v3522_v57 }
 0x34c   : > { %2047 = vst [vmem:[%s3590_s30 + $0x8] sm:$0xff] %v2015_v31  ;;  %v2014_v47 = vsel %vm2013_vm3, %v1946_v40, %v1981_v39  ;;  %v1916_v45 = vmul.f32 -0.5, %v1826_v18  ;;  %v1687_v40 = vadd.f32 %v3575_v3, %v1654_v49  ;;  %v1656_v42 = vmul.f32 -0.5, %v3524_v61  ;;  %v2793_v49 = vld [vmem:[%s3140_s14 + $0x20] sm:$0xff]  ;;  %v2794_v18 = vld [vmem:[%s3140_s14 + $0x38] sm:$0xff] }
 0x34d   : > { %2079 = vst.msk [vmem:[%s3590_s30 + $0x8] sm:$0xff] %vm1553_vm1, %v1490_v54  ;;  %2046 = vst [vmem:[%s3590_s30] sm:$0xff] %v2014_v47  ;;  %v1949_v30 = vadd.f32 %v1917_v22, %v3575_v3  ;;  %v1492_v54 = vadd.f32 %v1460_v48, %v3303_v12  ;;  %v1461_v57 = vmul.f32 %v2793_v49, %v3270_v59  ;;  %v1659_v12 = vmul.f32 -0.5, %v3526_v62 }
 0x34e   : > { %2078 = vst.msk [vmem:[%s3590_s30] sm:$0xff] %vm1553_vm1, %v3299_v7  ;;  %v1948_v17 = vadd.f32 %v1916_v45, %v3575_v3  ;;  %v1835_v41 = vpop.xlane.xlu1 %1834  ;;  %v1464_v47 = vmul.f32 %v2794_v18, %v3270_v59  ;;  %v1658_v61 = vmul.f32 -0.5, %v3528_v1  ;;  %v1986_v45 = vsel %vm1980_vm2, %v1688_v37, 0.0 }
 0x34f   : > { %v2017_v8 = vsel %vm2013_vm3, %v1949_v30, %v1984_v23  ;;  %v1919_v39 = vmul.f32 -0.5, %v1835_v41  ;;  %v1832_v31 = vpop.xlane.xlu0 %1831  ;;  %v1985_v46 = vsel %vm1980_vm2, %v1687_v40, 0.0  ;;  %v1494_v23 = vadd.f32 %v1462_v27, %v3314_v24  ;;  %v2796_v24 = vld [vmem:[%s3140_s14 + $0x48] sm:$0xff] }
 0x350   : > { %2049 = vst [vmem:[%s3590_s30 + $0x18] sm:$0xff] %v2017_v8  ;;  %v2016_v7 = vsel %vm2013_vm3, %v1948_v17, %v1983_v0  ;;  %v1918_v22 = vmul.f32 -0.5, %v1832_v31  ;;  %v1690_v0 = vadd.f32 %v3575_v3, %v1657_v16  ;;  %v1689_v30 = vadd.f32 %v3575_v3, %v1656_v42  ;;  %v2795_v16 = vld [vmem:[%s3140_s14 + $0x30] sm:$0xff] }
 0x351   : > { %2081 = vst.msk [vmem:[%s3590_s30 + $0x18] sm:$0xff] %vm1553_vm1, %v1492_v54  ;;  %2048 = vst [vmem:[%s3590_s30 + $0x10] sm:$0xff] %v2016_v7  ;;  %v1951_v48 = vadd.f32 %v1919_v39, %v3575_v3  ;;  %v1493_v41 = vadd.f32 %v1461_v57, %v3320_v29  ;;  %v1466_v27 = vmul.f32 %v2796_v24, %v3270_v59  ;;  %v1661_v49 = vmul.f32 -0.5, %v3530_v5 }
 0x352   : > { %2080 = vst.msk [vmem:[%s3590_s30 + $0x10] sm:$0xff] %vm1553_vm1, %v3310_v19  ;;  %v1950_v62 = vadd.f32 %v1918_v22, %v3575_v3  ;;  %v1841_v1 = vpop.xlane.xlu1 %1840  ;;  %v1463_v19 = vmul.f32 %v2795_v16, %v3270_v59  ;;  %v1692_v42 = vadd.f32 %v3575_v3, %v1659_v12  ;;  %v1691_v39 = vadd.f32 %v3575_v3, %v1658_v61 }
 0x353   : > { %v2019_v37 = vsel %vm2013_vm3, %v1951_v48, %v1986_v45  ;;  %v1921_v17 = vmul.f32 -0.5, %v1841_v1  ;;  %v1838_v40 = vpop.xlane.xlu0 %1837  ;;  %v1988_v31 = vsel %vm1980_vm2, %v1690_v0, 0.0  ;;  %v1660_v57 = vmul.f32 -0.5, %v3532_v2  ;;  %v2797_v2 = vld [vmem:[%s3140_s14 + $0x40] sm:$0xff] }
 0x354   : > { %2051 = vst [vmem:[%s3590_s30 + $0x28] sm:$0xff] %v2019_v37  ;;  %v2018_v54 = vsel %vm2013_vm3, %v1950_v62, %v1985_v46  ;;  %v1920_v8 = vmul.f32 -0.5, %v1838_v40  ;;  %v1496_v18 = vadd.f32 %v1464_v47, %v3328_v38  ;;  %v1987_v12 = vsel %vm1980_vm2, %v1689_v30, 0.0  ;;  %v2798_v47 = vld [vmem:[%s3140_s14 + $0x58] sm:$0xff] }
 0x355   : > { %2083 = vst.msk [vmem:[%s3590_s30 + $0x28] sm:$0xff] %vm1553_vm1, %v1494_v23  ;;  %2050 = vst [vmem:[%s3590_s30 + $0x20] sm:$0xff] %v2018_v54  ;;  %v1953_v29 = vadd.f32 %v1921_v17, %v3575_v3  ;;  %v1495_v45 = vadd.f32 %v1463_v19, %v3334_v43  ;;  %v1465_v46 = vmul.f32 %v2797_v2, %v3270_v59  ;;  %v1990_v1 = vsel %vm1980_vm2, %v1692_v42, 0.0  ;;  %v2801_v2 = vld [vmem:[%s3140_s14 + $0x60] sm:$0xff] }
 0x356   : > { %2082 = vst.msk [vmem:[%s3590_s30 + $0x20] sm:$0xff] %vm1553_vm1, %v1493_v41  ;;  %v1952_v7 = vadd.f32 %v1920_v8, %v3575_v3  ;;  %v1847_v22 = vpop.xlane.xlu1 %1846  ;;  %v1468_v62 = vmul.f32 %v2798_v47, %v3270_v59  ;;  %v1989_v23 = vsel %vm1980_vm2, %v1691_v39, 0.0  ;;  %v1694_v30 = vadd.f32 %v3575_v3, %v1661_v49 }
 0x357   : > { %v2021_v61 = vsel %vm2013_vm3, %v1953_v29, %v1988_v31  ;;  %v1923_v48 = vmul.f32 -0.5, %v1847_v22  ;;  %v1844_v5 = vpop.xlane.xlu0 %1843  ;;  %v1693_v37 = vadd.f32 %v3575_v3, %v1660_v57  ;;  %v1663_v17 = vmul.f32 -0.5, %v3534_v53  ;;  %v2799_v53 = vld [vmem:[%s3140_s14 + $0x50] sm:$0xff] }
 0x358   : > { %2053 = vst [vmem:[%s3590_s30 + $0x38] sm:$0xff] %v2021_v61  ;;  %v2020_v0 = vsel %vm2013_vm3, %v1952_v7, %v1987_v12  ;;  %v1922_v38 = vmul.f32 -0.5, %v1844_v5  ;;  %v1498_v16 = vadd.f32 %v1466_v27, %v3342_v56  ;;  %v1662_v19 = vmul.f32 -0.5, %v3536_v9  ;;  %v2800_v56 = vld [vmem:[%s3140_s14 + $0x68] sm:$0xff] }
 0x359   : > { %2085 = vst.msk [vmem:[%s3590_s30 + $0x38] sm:$0xff] %vm1553_vm1, %v1496_v18  ;;  %2052 = vst [vmem:[%s3590_s30 + $0x30] sm:$0xff] %v2020_v0  ;;  %v1955_v43 = vadd.f32 %v1923_v48, %v3575_v3  ;;  %v1497_v42 = vadd.f32 %v1465_v46, %v3348_v63  ;;  %v1467_v39 = vmul.f32 %v2799_v53, %v3270_v59  ;;  %v1665_v9 = vmul.f32 -0.5, %v3538_v11 }
 0x35a   : > { %2084 = vst.msk [vmem:[%s3590_s30 + $0x30] sm:$0xff] %vm1553_vm1, %v1495_v45  ;;  %v1954_v40 = vadd.f32 %v1922_v38, %v3575_v3  ;;  %v1853_v41 = vpop.xlane.xlu1 %1852  ;;  %v1470_v27 = vmul.f32 %v2800_v56, %v3270_v59  ;;  %v1664_v49 = vmul.f32 -0.5, %v3540_v15  ;;  %v1992_v57 = vsel %vm1980_vm2, %v1694_v30, 0.0 }
 0x35b   : > { %v2023_v54 = vsel %vm2013_vm3, %v1955_v43, %v1990_v1  ;;  %v1925_v8 = vmul.f32 -0.5, %v1853_v41  ;;  %v1850_v24 = vpop.xlane.xlu0 %1849  ;;  %v1991_v7 = vsel %vm1980_vm2, %v1693_v37, 0.0  ;;  %v1696_v22 = vadd.f32 %v3575_v3, %v1663_v17 }
 0x35c   : > { %2055 = vst [vmem:[%s3590_s30 + $0x48] sm:$0xff] %v2023_v54  ;;  %v2022_v29 = vsel %vm2013_vm3, %v1954_v40, %v1989_v23  ;;  %v1924_v31 = vmul.f32 -0.5, %v1850_v24  ;;  %v1500_v18 = vadd.f32 %v1468_v62, %v3356_v13  ;;  %v1695_v12 = vadd.f32 %v3575_v3, %v1662_v19  ;;  %v2802_v13 = vld [vmem:[%s3140_s14 + $0x78] sm:$0xff] }
 0x35d   : > { %2087 = vst.msk [vmem:[%s3590_s30 + $0x48] sm:$0xff] %vm1553_vm1, %v1498_v16  ;;  %2054 = vst [vmem:[%s3590_s30 + $0x40] sm:$0xff] %v2022_v29  ;;  %v1957_v63 = vadd.f32 %v1925_v8, %v3575_v3  ;;  %v1499_v45 = vadd.f32 %v1467_v39, %v3362_v52  ;;  %v1469_v46 = vmul.f32 %v2801_v2, %v3270_v59  ;;  %v1994_v23 = vsel %vm1980_vm2, %v1696_v22, 0.0 }
 0x35e   : > { %2086 = vst.msk [vmem:[%s3590_s30 + $0x40] sm:$0xff] %vm1553_vm1, %v1497_v42  ;;  %v1956_v11 = vadd.f32 %v1924_v31, %v3575_v3  ;;  %v1859_v15 = vpop.xlane.xlu1 %1858  ;;  %v1472_v47 = vmul.f32 %v2802_v13, %v3270_v59  ;;  %v1698_v62 = vadd.f32 %v3575_v3, %v1665_v9  ;;  %v1697_v1 = vadd.f32 %v3575_v3, %v1664_v49  ;;  %v2804_v42 = vld [vmem:[%s3140_s14 + $0x88] sm:$0xff] }
 0x35f   : > { %v2025_v61 = vsel %vm2013_vm3, %v1957_v63, %v1992_v57  ;;  %v1927_v48 = vmul.f32 -0.5, %v1859_v15  ;;  %v1856_v5 = vpop.xlane.xlu0 %1855  ;;  %v1667_v43 = vmul.f32 -0.5, %v3542_v51  ;;  %v1666_v30 = vmul.f32 -0.5, %v3544_v20  ;;  %v2803_v20 = vld [vmem:[%s3140_s14 + $0x70] sm:$0xff] }
 0x360   : > { %2057 = vst [vmem:[%s3590_s30 + $0x58] sm:$0xff] %v2025_v61  ;;  %v2024_v0 = vsel %vm2013_vm3, %v1956_v11, %v1991_v7  ;;  %v1926_v38 = vmul.f32 -0.5, %v1856_v5  ;;  %v1502_v40 = vadd.f32 %v1470_v27, %v3370_v28  ;;  %v1993_v41 = vsel %vm1980_vm2, %v1695_v12, 0.0 }
 0x361   : > { %2089 = vst.msk [vmem:[%s3590_s30 + $0x58] sm:$0xff] %vm1553_vm1, %v1500_v18  ;;  %2056 = vst [vmem:[%s3590_s30 + $0x50] sm:$0xff] %v2024_v0  ;;  %v1959_v52 = vadd.f32 %v1927_v48, %v3575_v3  ;;  %v1501_v54 = vadd.f32 %v1469_v46, %v3376_v34  ;;  %v1471_v8 = vmul.f32 %v2803_v20, %v3270_v59  ;;  %v1996_v39 = vsel %vm1980_vm2, %v1698_v62, 0.0 }
 0x362   : > { %2088 = vst.msk [vmem:[%s3590_s30 + $0x50] sm:$0xff] %vm1553_vm1, %v1499_v45  ;;  %v1958_v37 = vadd.f32 %v1926_v38, %v3575_v3  ;;  %v1865_v17 = vpop.xlane.xlu1 %1864  ;;  %v1474_v53 = vmul.f32 %v2804_v42, %v3270_v59  ;;  %v1995_v29 = vsel %vm1980_vm2, %v1697_v1, 0.0  ;;  %v1700_v31 = vadd.f32 %v3575_v3, %v1667_v43 }
 0x363   : > { %v2027_v16 = vsel %vm2013_vm3, %v1959_v52, %v1994_v23  ;;  %v1929_v19 = vmul.f32 -0.5, %v1865_v17  ;;  %v1862_v51 = vpop.xlane.xlu0 %1861  ;;  %v1699_v56 = vadd.f32 %v3575_v3, %v1666_v30  ;;  %v1669_v27 = vmul.f32 -0.5, %v3546_v21  ;;  %v2805_v21 = vld [vmem:[%s3140_s14 + $0x80] sm:$0xff]  ;;  %v2807_v52 = vld [vmem:[%s3140_s14 + $0x90] sm:$0xff]  ;;  %v2808_v30 = vld [vmem:[%s3140_s14 + $0xa8] sm:$0xff] }
 0x364   : > { %2059 = vst [vmem:[%s3590_s30 + $0x68] sm:$0xff] %v2027_v16  ;;  %v2026_v24 = vsel %vm2013_vm3, %v1958_v37, %v1993_v41  ;;  %v1928_v28 = vmul.f32 -0.5, %v1862_v51  ;;  %v1504_v63 = vadd.f32 %v1472_v47, %v3384_v44  ;;  %v1668_v57 = vmul.f32 -0.5, %v3548_v55  ;;  %v2806_v44 = vld [vmem:[%s3140_s14 + $0x98] sm:$0xff]  ;;  %v3821_v37 = vld [vmem:[%s4004_s10] ss:$0 sm:$0xff] }
 0x365   : > { %2091 = vst.msk [vmem:[%s3590_s30 + $0x68] sm:$0xff] %vm1553_vm1, %v1502_v40  ;;  %2058 = vst [vmem:[%s3590_s30 + $0x60] sm:$0xff] %v2026_v24  ;;  %v1961_v34 = vadd.f32 %v1929_v19, %v3575_v3  ;;  %v1503_v15 = vadd.f32 %v1471_v8, %v3390_v50  ;;  %v1473_v18 = vmul.f32 %v2805_v21, %v3270_v59  ;;  %v1671_v55 = vmul.f32 -0.5, %v3550_v26 }
 0x366   : > { %2090 = vst.msk [vmem:[%s3590_s30 + $0x60] sm:$0xff] %vm1553_vm1, %v1501_v54  ;;  %v1960_v9 = vadd.f32 %v1928_v28, %v3575_v3  ;;  %v1871_v49 = vpop.xlane.xlu1 %1870  ;;  %v1476_v48 = vmul.f32 %v2806_v44, %v3270_v59  ;;  %v1670_v5 = vmul.f32 -0.5, %v3552_v33  ;;  %v1998_v45 = vsel %vm1980_vm2, %v1700_v31, 0.0 }
 0x367   : > { %v2029_v7 = vsel %vm2013_vm3, %v1961_v34, %v1996_v39  ;;  %v1931_v22 = vmul.f32 -0.5, %v1871_v49  ;;  %v1868_v11 = vpop.xlane.xlu0 %1867  ;;  %v1997_v2 = vsel %vm1980_vm2, %v1699_v56, 0.0  ;;  %v1702_v46 = vadd.f32 %v3575_v3, %v1669_v27 }
 0x368   : > { %2061 = vst [vmem:[%s3590_s30 + $0x78] sm:$0xff] %v2029_v7  ;;  %v2028_v12 = vsel %vm2013_vm3, %v1960_v9, %v1995_v29  ;;  %v1930_v61 = vmul.f32 -0.5, %v1868_v11  ;;  %v1506_v0 = vadd.f32 %v1474_v53, %v3398_v6  ;;  %v1701_v38 = vadd.f32 %v3575_v3, %v1668_v57  ;;  %v2811_v29 = vld [vmem:[%s3140_s14 + $0xb8] sm:$0xff] }
 0x369   : > { %2093 = vst.msk [vmem:[%s3590_s30 + $0x78] sm:$0xff] %vm1553_vm1, %v1504_v63  ;;  %2060 = vst [vmem:[%s3590_s30 + $0x70] sm:$0xff] %v2028_v12  ;;  %v1963_v50 = vadd.f32 %v1931_v22, %v3575_v3  ;;  %v1505_v1 = vadd.f32 %v1473_v18, %v3404_v14  ;;  %v1475_v23 = vmul.f32 %v2807_v52, %v3270_v59  ;;  %v2000_v41 = vsel %vm1980_vm2, %v1702_v46, 0.0  ;;  %v4031_v18 = vld [vmem:[#allocation3_spill] sm:$0xff] }
 0x36a   : > { %2092 = vst.msk [vmem:[%s3590_s30 + $0x70] sm:$0xff] %vm1553_vm1, %v1503_v15  ;;  %v1962_v26 = vadd.f32 %v1930_v61, %v3575_v3  ;;  %v1877_v33 = vpop.xlane.xlu1 %1876  ;;  %v1478_v17 = vmul.f32 %v3821_v37, %v2808_v30  ;;  %v1704_v40 = vadd.f32 %v3575_v3, %v1671_v55  ;;  %v1703_v14 = vadd.f32 %v3575_v3, %v1670_v5  ;;  %v2814_v30 = vld [vmem:[%s3140_s14 + $0xc0] sm:$0xff] }
 0x36b   : > { %v2031_v13 = vsel %vm2013_vm3, %v1963_v50, %v1998_v45  ;;  %v1933_v47 = vmul.f32 -0.5, %v1877_v33  ;;  %v1874_v62 = vpop.xlane.xlu0 %1873  ;;  %v1673_v16 = vmul.f32 -0.5, %v3554_v35  ;;  %v1672_v19 = vmul.f32 -0.5, %v3556_v4  ;;  %v2810_v4 = vld [vmem:[%s3140_s14 + $0xa0] sm:$0xff] }
 0x36c   : > { %2063 = vst [vmem:[%s3590_s30 + $0x88] sm:$0xff] %v2031_v13  ;;  %v2030_v43 = vsel %vm2013_vm3, %v1962_v26, %v1997_v2  ;;  %v1932_v6 = vmul.f32 -0.5, %v1874_v62  ;;  %v1508_v20 = vadd.f32 %v1476_v48, %v3412_v25  ;;  %v1999_v8 = vsel %vm1980_vm2, %v1701_v38, 0.0  ;;  %v4033_v50 = vld [vmem:[#allocation15_spill] sm:$0xff]  ;;  %v4034_v13 = vld [vmem:[#allocation4_spill] sm:$0xff] }
 0x36d   : > { %2095 = vst.msk [vmem:[%s3590_s30 + $0x88] sm:$0xff] %vm1553_vm1, %v1506_v0  ;;  %2062 = vst [vmem:[%s3590_s30 + $0x80] sm:$0xff] %v2030_v43  ;;  %v1965_v59 = vadd.f32 %v1933_v47, %v3575_v3  ;;  %v1507_v42 = vadd.f32 %v1475_v23, %v3418_v32  ;;  %v1477_v53 = vmul.f32 %v2810_v4, %v3821_v37  ;;  %v2002_v31 = vsel %vm1980_vm2, %v1704_v40, 0.0  ;;  %v4035_v43 = vld [vmem:[#allocation5_spill] sm:$0xff]  ;;  %v4038_v4 = vld [vmem:[#allocation6_spill] sm:$0xff] }
 0x36e   : > { %2094 = vst.msk [vmem:[%s3590_s30 + $0x80] sm:$0xff] %vm1553_vm1, %v1505_v1  ;;  %v1964_v51 = vadd.f32 %v1932_v6, %v3575_v3  ;;  %v1883_v54 = vpop.xlane.xlu1 %1882  ;;  %v1480_v34 = vmul.f32 %v2811_v29, %v3821_v37  ;;  %v2001_v56 = vsel %vm1980_vm2, %v1703_v14, 0.0  ;;  %v1706_v27 = vadd.f32 %v3575_v3, %v1673_v16 }
 0x36f   : > { %v2033_v24 = vsel %vm2013_vm3, %v1965_v59, %v2000_v41  ;;  %v1935_v28 = vmul.f32 -0.5, %v1883_v54  ;;  %v1880_v35 = vpop.xlane.xlu0 %1879  ;;  %v1705_v9 = vadd.f32 %v3575_v3, %v1672_v19  ;;  %v1675_v49 = vmul.f32 -0.5, %v3558_v36  ;;  %v2812_v36 = vld [vmem:[%s3140_s14 + $0xb0] sm:$0xff]  ;;  %v2815_v59 = vld [vmem:[%s3140_s14 + $0xd8] sm:$0xff] }
 0x370   : > { %2065 = vst [vmem:[%s3590_s30 + $0x98] sm:$0xff] %v2033_v24  ;;  %v2032_v39 = vsel %vm2013_vm3, %v1964_v51, %v1999_v8  ;;  %v1934_v25 = vmul.f32 -0.5, %v1880_v35  ;;  %v1510_v7 = vadd.f32 %v1478_v17, %v3426_v10  ;;  %v1674_v22 = vmul.f32 -0.5, %v3560_v60  ;;  %v2813_v10 = vld [vmem:[%s3140_s14 + $0xc8] sm:$0xff]  ;;  %v4032_v60 = vld [vmem:[#allocation14_spill] sm:$0xff]  ;;  %v4037_v24 = vld [vmem:[#allocation17_spill] sm:$0xff] }
 0x371   : > { %2097 = vst.msk [vmem:[%s3590_s30 + $0x98] sm:$0xff] %vm1553_vm1, %v1508_v20  ;;  %2064 = vst [vmem:[%s3590_s30 + $0x90] sm:$0xff] %v2032_v39  ;;  %v1967_v32 = vadd.f32 %v1935_v28, %v3575_v3  ;;  %v1509_v12 = vadd.f32 %v1477_v53, %v4031_v18  ;;  %v1479_v61 = vmul.f32 %v2812_v36, %v3821_v37  ;;  %v1677_v5 = vmul.f32 -0.5, %v4032_v60  ;;  %v4036_v20 = vld [vmem:[#allocation16_spill] sm:$0xff]  ;;  %v4043_v60 = vld [vmem:[#allocation9_spill] sm:$0xff] }
 0x372   : > { %2096 = vst.msk [vmem:[%s3590_s30 + $0x90] sm:$0xff] %vm1553_vm1, %v1507_v42  ;;  %v1966_v63 = vadd.f32 %v1934_v25, %v3575_v3  ;;  %v1889_v57 = vpop.xlane.xlu1 %1888  ;;  %v1482_v55 = vmul.f32 %v2813_v10, %v3821_v37  ;;  %v1676_v45 = vmul.f32 -0.5, %v4033_v50  ;;  %v2004_v46 = vsel %vm1980_vm2, %v1706_v27, 0.0 }
 0x373   : > { %v2035_v11 = vsel %vm2013_vm3, %v1967_v32, %v2002_v31  ;;  %v1937_v15 = vmul.f32 -0.5, %v1889_v57  ;;  %v1886_v21 = vpop.xlane.xlu0 %1885  ;;  %v2003_v26 = vsel %vm1980_vm2, %v1705_v9, 0.0  ;;  %v1708_v33 = vadd.f32 %v3575_v3, %v1675_v49  ;;  %v4039_v31 = vld [vmem:[#allocation7_spill] sm:$0xff]  ;;  %v2816_v32 = vld [vmem:[%s3140_s14 + $0xd0] sm:$0xff] }
 0x374   : > { %2067 = vst [vmem:[%s3590_s30 + $0xa8] sm:$0xff] %v2035_v11  ;;  %v2034_v44 = vsel %vm2013_vm3, %v1966_v63, %v2001_v56  ;;  %v1936_v48 = vmul.f32 -0.5, %v1886_v21  ;;  %v1512_v47 = vadd.f32 %v1480_v34, %v4034_v13  ;;  %v1707_v62 = vadd.f32 %v3575_v3, %v1674_v22  ;;  %v4040_v11 = vld [vmem:[#allocation18_spill] sm:$0xff] }
 0x375   : > { %2099 = vst.msk [vmem:[%s3590_s30 + $0xa8] sm:$0xff] %vm1553_vm1, %v1510_v7  ;;  %2066 = vst [vmem:[%s3590_s30 + $0xa0] sm:$0xff] %v2034_v44  ;;  %v1969_v2 = vadd.f32 %v1937_v15, %v3575_v3  ;;  %v1511_v6 = vadd.f32 %v1479_v61, %v4035_v43  ;;  %v1481_v17 = vmul.f32 %v2814_v30, %v3821_v37  ;;  %v2006_v54 = vsel %vm1980_vm2, %v1708_v33, 0.0  ;;  %v4042_v61 = vld [vmem:[#allocation19_spill] sm:$0xff]  ;;  %v4044_v43 = vld [vmem:[#allocation10_spill] sm:$0xff] }
 0x376   : > { %2098 = vst.msk [vmem:[%s3590_s30 + $0xa0] sm:$0xff] %vm1553_vm1, %v1509_v12  ;;  %v1968_v0 = vadd.f32 %v1936_v48, %v3575_v3  ;;  %v1895_v38 = vpop.xlane.xlu1 %1894  ;;  %v1484_v41 = vmul.f32 %v2815_v59, %v3821_v37  ;;  %v1710_v16 = vadd.f32 %v3575_v3, %v1677_v5  ;;  %v1709_v19 = vadd.f32 %v3575_v3, %v1676_v45  ;;  %v4041_v12 = vld [vmem:[#allocation8_spill] sm:$0xff] }
 0x377   : > { %v2037_v1 = vsel %vm2013_vm3, %v1969_v2, %v2004_v46  ;;  %v1939_v52 = vmul.f32 -0.5, %v1895_v38  ;;  %v1892_v23 = vpop.xlane.xlu0 %1891  ;;  %v1679_v8 = vmul.f32 -0.5, %v4036_v20  ;;  %v1678_v28 = vmul.f32 -0.5, %v4037_v24 }
 0x378   : > { %2069 = vst [vmem:[%s3590_s30 + $0xb8] sm:$0xff] %v2037_v1  ;;  %v2036_v40 = vsel %vm2013_vm3, %v1968_v0, %v2003_v26  ;;  %v1938_v14 = vmul.f32 -0.5, %v1892_v23  ;;  %v1514_v53 = vadd.f32 %v1482_v55, %v4038_v4  ;;  %v2005_v39 = vsel %vm1980_vm2, %v1707_v62, 0.0 }
 0x379   : > { %2101 = vst.msk [vmem:[%s3590_s30 + $0xb8] sm:$0xff] %vm1553_vm1, %v1512_v47  ;;  %2068 = vst [vmem:[%s3590_s30 + $0xb0] sm:$0xff] %v2036_v40  ;;  %v1971_v51 = vadd.f32 %v1939_v52, %v3575_v3  ;;  %v1513_v56 = vadd.f32 %v1481_v17, %v4039_v31  ;;  %v1483_v27 = vmul.f32 %v2816_v32, %v3821_v37  ;;  %v2008_v63 = vsel %vm1980_vm2, %v1710_v16, 0.0  ;;  %v4045_v17 = vld [vmem:[#allocation11_spill] sm:$0xff]  ;;  %v4046_v16 = vld [vmem:[#allocation12_spill] sm:$0xff] }
 0x37a   : > { %2100 = vst.msk [vmem:[%s3590_s30 + $0xb0] sm:$0xff] %vm1553_vm1, %v1511_v6  ;;  %v1970_v35 = vadd.f32 %v1938_v14, %v3575_v3  ;;  %v1901_v42 = vpop.xlane.xlu1 %1900  ;;  %v2007_v57 = vsel %vm1980_vm2, %v1709_v19, 0.0  ;;  %v1712_v37 = vadd.f32 %v3575_v3, %v1679_v8  ;;  %v1711_v22 = vadd.f32 %v3575_v3, %v1678_v28  ;;  %v4047_v19 = vld [vmem:[#allocation13_spill] sm:$0xff] }
 0x37b   : > { %v2039_v25 = vsel %vm2013_vm3, %v1971_v51, %v2006_v54  ;;  %v1941_v29 = vmul.f32 -0.5, %v1901_v42  ;;  %v1898_v34 = vpop.xlane.xlu0 %1897  ;;  %v1681_v15 = vmul.f32 -0.5, %v4040_v11  ;;  %v1516_v36 = vadd.f32 %v1484_v41, %v4041_v12 }
 0x37c   : > { %2071 = vst [vmem:[%s3590_s30 + $0xc8] sm:$0xff] %v2039_v25  ;;  %v2038_v9 = vsel %vm2013_vm3, %v1970_v35, %v2005_v39  ;;  %v1940_v49 = vmul.f32 -0.5, %v1898_v34  ;;  %v1680_v44 = vmul.f32 -0.5, %v4042_v61  ;;  %v1515_v5 = vadd.f32 %v1483_v27, %v4043_v60 }
 0x37d   : > { %2103 = vst.msk [vmem:[%s3590_s30 + $0xc8] sm:$0xff] %vm1553_vm1, %v1514_v53  ;;  %2070 = vst [vmem:[%s3590_s30 + $0xc0] sm:$0xff] %v2038_v9  ;;  %v1973_v7 = vadd.f32 %v1941_v29, %v3575_v3  ;;  %v2010_v46 = vsel %vm1980_vm2, %v1712_v37, 0.0  ;;  %v1714_v26 = vadd.f32 %v3575_v3, %v1681_v15  ;;  %v2009_v38 = vsel %vm1980_vm2, %v1711_v22, 0.0 }
 0x37e   : > { %2102 = vst.msk [vmem:[%s3590_s30 + $0xc0] sm:$0xff] %vm1553_vm1, %v1513_v56  ;;  %v1972_v21 = vadd.f32 %v1940_v49, %v3575_v3  ;;  %v1907_v18 = vpop.xlane.xlu1 %1906  ;;  %v1713_v13 = vadd.f32 %v3575_v3, %v1680_v44 }
 0x37f   : > { %v2041_v48 = vsel %vm2013_vm3, %v1973_v7, %v2008_v63  ;;  %v1943_v10 = vmul.f32 -0.5, %v1907_v18  ;;  %v1904_v55 = vpop.xlane.xlu0 %1903  ;;  %v2012_v30 = vsel %vm1980_vm2, %v1714_v26, 0.0 }
 0x380   : > { %2073 = vst [vmem:[%s3590_s30 + $0xd8] sm:$0xff] %v2041_v48  ;;  %v2040_v50 = vsel %vm2013_vm3, %v1972_v21, %v2007_v57  ;;  %v1942_v45 = vmul.f32 -0.5, %v1904_v55  ;;  %v2011_v14 = vsel %vm1980_vm2, %v1713_v13, 0.0 }
 0x381   : > { %2105 = vst.msk [vmem:[%s3590_s30 + $0xd8] sm:$0xff] %vm1553_vm1, %v1516_v36  ;;  %2072 = vst [vmem:[%s3590_s30 + $0xd0] sm:$0xff] %v2040_v50  ;;  %v1975_v2 = vadd.f32 %v1943_v10, %v3575_v3 }
 0x382   : > { %2104 = vst.msk [vmem:[%s3590_s30 + $0xd0] sm:$0xff] %vm1553_vm1, %v1515_v5  ;;  %v1974_v33 = vadd.f32 %v1942_v45, %v3575_v3  ;;  %v1913_v0 = vpop.xlane.xlu1 %1912 }
 0x383   : > { %v2043_v47 = vsel %vm2013_vm3, %v1975_v2, %v2010_v46  ;;  %v1945_v62 = vmul.f32 -0.5, %v1913_v0  ;;  %v1910_v1 = vpop.xlane.xlu0 %1909 }
 0x384   : > { %2075 = vst [vmem:[%s3590_s30 + $0xe8] sm:$0xff] %v2043_v47  ;;  %v2042_v52 = vsel %vm2013_vm3, %v1974_v33, %v2009_v38  ;;  %v1944_v23 = vmul.f32 -0.5, %v1910_v1 }
 0x385   : > { %2107 = vst.msk [vmem:[%s3590_s30 + $0xe8] sm:$0xff] %vm1553_vm1, %v4044_v43  ;;  %2074 = vst [vmem:[%s3590_s30 + $0xe0] sm:$0xff] %v2042_v52  ;;  %v1977_v6 = vadd.f32 %v1945_v62, %v3575_v3 }
 0x386   : > { %2106 = vst.msk [vmem:[%s3590_s30 + $0xe0] sm:$0xff] %vm1553_vm1, %v4045_v17  ;;  %v1976_v40 = vadd.f32 %v1944_v23, %v3575_v3 }
 0x387   : > { %v2045_v59 = vsel %vm2013_vm3, %v1977_v6, %v2012_v30 }
 0x388   : > { %2077 = vst [vmem:[%s3590_s30 + $0xf8] sm:$0xff] %v2045_v59  ;;  %v2044_v41 = vsel %vm2013_vm3, %v1976_v40, %v2011_v14 }
 0x389   : > { %2109 = vst.msk [vmem:[%s3590_s30 + $0xf8] sm:$0xff] %vm1553_vm1, %v4046_v16  ;;  %2076 = vst [vmem:[%s3590_s30 + $0xf0] sm:$0xff] %v2044_v41 }
 0x38a   : > { %2108 = vst.msk [vmem:[%s3590_s30 + $0xf0] sm:$0xff] %vm1553_vm1, %v4047_v19 }
 0x38b PF: > { %s23_s23 = sadd.s32 1, %s2823_s23  }
 0x38c   : > { %p20_p4 = scmp.ge.s32.totalorder %s23_s23, 4  }
 0x38e   :  { %22 = sbr.rel (!%p20_p4) target bundleno = 2 (0x2), region = 104 }

</bundles_post_ra>
